<compile_context>
chip_gen: v5e
topology: v5e:2x2
jax: 0.10.0
libtpu: 0.0.40
codegen_flags: <defaults>
</compile_context>

<pallas_src>
import jax
import jax.numpy as jnp
from jax import lax
from jax.experimental import pallas as pl
from jax.experimental.pallas import tpu as pltpu

# ----------------- synthetic config (cfg.MODEL.ROI_ACTION_HEAD / cfg.TEST) -----------------
NUM_CLASSES = 16          # MODEL.ROI_ACTION_HEAD.NUM_CLASSES
NUM_POSE = 6              # MODEL.ROI_ACTION_HEAD.NUM_PERSON_MOVEMENT_CLASSES
POOLER_RESOLUTION = 4     # MODEL.ROI_ACTION_HEAD.POOLER_RESOLUTION
POOLER_SCALE = 0.25       # MODEL.ROI_ACTION_HEAD.POOLER_SCALE (feature stride 4)
SAMPLING_RATIO = 2        # MODEL.ROI_ACTION_HEAD.POOLER_SAMPLING_RATIO
MLP_HEAD_DIM = 32         # MODEL.ROI_ACTION_HEAD.MLP_HEAD_DIM
DROPOUT_RATE = 0.0        # inference: dropout is identity
TEST_EXTEND_SCALE = (0.1, 0.05)   # cfg.TEST.EXTEND_SCALE


def _device_kind():
    try:
        return jax.devices()[0].device_kind.lower()
    except Exception:
        return ""


def _pick_roi_tile():
    """ROIs per grid step. res2*R rows must fill the MXU: 128 rows on v5e (4x128x128 MXU),
    256 rows on v6e/v7x (2x256x256 MXU)."""
    kind = _device_kind()
    for old in ("v2", "v3", "v4", "v5"):
        if old in kind:
            return 8
    return 16


def _mean_vmem_budget_bytes():
    """Per-block byte budget for the temporal-mean kernel (double-buffered by Pallas)."""
    kind = _device_kind()
    if "v7" in kind:
        return 3 * 1024 * 1024      # 64 MiB physical VMEM -> stay modest
    return 6 * 1024 * 1024          # 128 MiB VMEM on v5e/v6e


ROI_TILE = _pick_roi_tile()


# ============================== kernel 1: temporal mean ==============================
def _temporal_mean_kernel(x_ref, o_ref):
    # x_ref: (1, Ct, T, HW) f32 (T on sublanes, HW on lanes); o_ref: (1, HW, Ct) bf16.
    # Mean accumulates in f32; the (Ct,HW)->(HW,Ct) transpose uses the XLU slot which has slack
    # because this kernel is HBM-bound, so the layout change is effectively free.
    m = jnp.mean(x_ref[...], axis=2)                         # (1, Ct, HW) f32
    o_ref[0] = jnp.transpose(m[0]).astype(o_ref.dtype)       # (HW, Ct)


def _pick_channel_tile(C, T, HW, itemsize, budget_bytes):
    """Channel tile for the mean kernel.  The transposed output block puts channels on lanes,
    so Ct must equal C or be a multiple of 128.  The T axis pads to >=8 sublanes in VMEM."""
    t_pad = max(T, 8)
    full = C * t_pad * HW * itemsize
    if full <= budget_bytes or C % 128 != 0:
        return C
    best = 128
    for ct in range(128, C + 1, 128):
        if C % ct == 0 and ct * t_pad * HW * itemsize <= budget_bytes:
            best = ct
    return best


def temporal_mean_transposed(x_bcthw, out_dtype=jnp.bfloat16):
    """NCTHW -> (B, H*W, C) mean over T.  Reads the native layout (free reshape) and emits the
    lane-dense (HW, C) layout directly so no XLA transpose pass is needed downstream."""
    B, C, T, H, W = x_bcthw.shape
    HW = H * W
    x = x_bcthw.reshape(B, C, T, HW)                         # free reshape (collapse H,W)
    Ct = _pick_channel_tile(C, T, HW, jnp.dtype(x.dtype).itemsize, _mean_vmem_budget_bytes())
    return pl.pallas_call(
        _temporal_mean_kernel,
        out_shape=jax.ShapeDtypeStruct((B, HW, C), out_dtype),
        grid=(B, C // Ct),
        in_specs=[pl.BlockSpec((1, Ct, T, HW), lambda b, c: (b, c, 0, 0))],
        out_specs=pl.BlockSpec((1, HW, Ct), lambda b, c: (b, 0, c)),
        compiler_params=pltpu.CompilerParams(
            dimension_semantics=("parallel", "parallel")),
    )(x)


# ======= kernel 2: fused ROIAlign(matmul) + MaxPool3d + MLP head + predictor + probs =======
def _roi_head_kernel(w_ref, f_ref, w1_ref, b1_ref, w2_ref, b2_ref, wc_ref, bc_ref,
                     pooled_ref, prob_ref):
    res2 = POOLER_RESOLUTION * POOLER_RESOLUTION
    R = pooled_ref.shape[2]

    # ROIAlign bins for a tile of R ROIs in one bf16 MXU matmul, f32 accumulation.
    # w_ref: (1, 1, res2*R, HW) bf16 (rows bin-major: row = bin*R + roi_slot)
    # f_ref: (1, HW, C)         bf16 (per-image feature, resident across the ROI-tile axis)
    bins = jnp.dot(w_ref[0, 0], f_ref[0],
                   preferred_element_type=jnp.float32)        # (res2*R, C) f32

    # MaxPool3d((1, res, res)) == max over the res*res bins of every ROI.
    # Rows are bin-major so this is res2-1 maxima over aligned R-row slices (pure VPU).
    pooled = bins[0:R]
    for k in range(1, res2):
        pooled = jnp.maximum(pooled, bins[k * R:(k + 1) * R])  # (R, C)
    pooled_ref[...] = pooled[None, None]

    # fc1 -> relu -> fc2 -> relu -> cls_score ; bf16 MXU operands, f32 accumulation/epilogue.
    x = pooled.astype(jnp.bfloat16)
    h1 = jnp.maximum(jnp.dot(x, w1_ref[...],
                             preferred_element_type=jnp.float32) + b1_ref[...], 0.0)
    h2 = jnp.maximum(jnp.dot(h1.astype(jnp.bfloat16), w2_ref[...],
                             preferred_element_type=jnp.float32) + b2_ref[...], 0.0)
    logits = jnp.dot(h2.astype(jnp.bfloat16), wc_ref[...],
                     preferred_element_type=jnp.float32) + bc_ref[...]

    # PostProcessor: softmax over the first NUM_POSE classes, sigmoid on the rest.
    col = lax.broadcasted_iota(jnp.int32, logits.shape, 1)
    is_pose = col < NUM_POSE
    neg = jnp.finfo(jnp.float32).min
    m = jnp.max(jnp.where(is_pose, logits, neg), axis=-1, keepdims=True)
    e = jnp.where(is_pose, jnp.exp(logits - m), 0.0)
    s = jnp.sum(e, axis=-1, keepdims=True)
    inv_s = pl.reciprocal(s, approx=True)                     # EUP slot, idle in this epilogue
    prob = jnp.where(is_pose, e * inv_s, jax.nn.sigmoid(logits))
    prob_ref[...] = prob[None, None]


def _roi_cost(B, Tmax, R, HW, C, Hd, K):
    res2 = POOLER_RESOLUTION * POOLER_RESOLUTION
    rows = res2 * R
    per_tile_flops = 2 * rows * HW * C + 2 * R * (C * Hd + Hd * Hd + Hd * K)
    return pl.CostEstimate(
        flops=B * Tmax * per_tile_flops,
        transcendentals=B * Tmax * R * K,                               # exp / sigmoid
        bytes_accessed=(B * Tmax * rows * HW * 2                         # packed_w (bf16)
                        + B * HW * C * 2                                 # per-image feature
                        + B * Tmax * R * (C + K) * 4                     # f32 outputs
                        + (C * Hd + Hd * Hd + Hd * K) * 2 + (2 * Hd + K) * 4))


def _roi_vmem_limit(R, HW, C, Hd, K):
    """Rough per-step VMEM residency; only raise the scoped limit when it is actually needed."""
    res2 = POOLER_RESOLUTION * POOLER_RESOLUTION
    rows = res2 * R
    step = (2 * rows * HW * 2                                 # packed_w, double-buffered bf16
            + 2 * HW * C * 2                                  # feature, double-buffered bf16
            + 2 * (C * Hd + Hd * Hd + Hd * K) * 2             # bf16 weights (double-buffered)
            + 2 * (2 * Hd + K) * 4                            # f32 biases
            + 2 * R * (C + K) * 4                             # f32 outputs (double-buffered)
            + rows * C * 4 + 4 * R * max(C, Hd, K) * 4)       # in-kernel temporaries
    if step <= 24 * 1024 * 1024:
        return None                                           # default scoped limit is enough
    return int(min(100 * 1024 * 1024, 2 * step))


def roi_pool_and_head(feat_hw_c, packed_w, params, R):
    """feat_hw_c: (B, HW, C) bf16; packed_w: (B, Tmax, res2*R, HW) bf16."""
    B, HW, C = feat_hw_c.shape
    _, Tmax, rows, _ = packed_w.shape
    res2 = POOLER_RESOLUTION * POOLER_RESOLUTION
    assert rows == res2 * R
    Hd = params["w1"].shape[1]
    K = params["wc"].shape[1]
    w1 = params["w1"].astype(jnp.bfloat16)
    w2 = params["w2"].astype(jnp.bfloat16)
    wc = params["wc"].astype(jnp.bfloat16)
    # Megacore shards along B (each core keeps its own per-image feature resident); only expose
    # the inner ROI-tile axis to megacore when there is a single image.
    dims = ("parallel", "arbitrary") if B > 1 else ("parallel", "parallel")
    pooled, prob = pl.pallas_call(
        _roi_head_kernel,
        out_shape=(jax.ShapeDtypeStruct((B, Tmax, R, C), jnp.float32),
                   jax.ShapeDtypeStruct((B, Tmax, R, K), jnp.float32)),
        grid=(B, Tmax),
        in_specs=[
            pl.BlockSpec((1, 1, rows, HW), lambda b, t: (b, t, 0, 0)),  # ROI-tile weights
            pl.BlockSpec((1, HW, C), lambda b, t: (b, 0, 0)),  # per-image features (DMA once per image)
            pl.BlockSpec((C, Hd), lambda b, t: (0, 0)),        # fc1 weight (resident, bf16)
            pl.BlockSpec((1, Hd), lambda b, t: (0, 0)),
            pl.BlockSpec((Hd, Hd), lambda b, t: (0, 0)),       # fc2 weight
            pl.BlockSpec((1, Hd), lambda b, t: (0, 0)),
            pl.BlockSpec((Hd, K), lambda b, t: (0, 0)),        # cls_score weight
            pl.BlockSpec((1, K), lambda b, t: (0, 0)),
        ],
        out_specs=(
            pl.BlockSpec((1, 1, R, C), lambda b, t: (b, t, 0, 0)),
            pl.BlockSpec((1, 1, R, K), lambda b, t: (b, t, 0, 0)),
        ),
        compiler_params=pltpu.CompilerParams(
            dimension_semantics=dims,
            vmem_limit_bytes=_roi_vmem_limit(R, HW, C, Hd, K)),
        cost_estimate=_roi_cost(B, Tmax, R, HW, C, Hd, K),
    )(packed_w, feat_hw_c, w1, params["b1"], w2, params["b2"], wc, params["bc"])
    return pooled, prob


# ============================ glue: ROIAlign bilinear weight matrix ============================
def build_roi_align_weights(rois, H, W, res, scale, sampling_ratio):
    """rois: (N,4) xyxy image coords. Returns (N, res*res, H*W) f32 weights such that
    weights @ flat_feature reproduces ROIAlign (sampling-ratio averaged bilinear bins)."""
    g = sampling_ratio
    x1, y1, x2, y2 = rois[:, 0] * scale, rois[:, 1] * scale, rois[:, 2] * scale, rois[:, 3] * scale
    roi_w = jnp.maximum(x2 - x1, 1.0)
    roi_h = jnp.maximum(y2 - y1, 1.0)
    bin_w = roi_w / res
    bin_h = roi_h / res

    def axis_weights(start, bin_sz, size):
        p = jnp.arange(res, dtype=jnp.float32)[None, :, None]
        i = jnp.arange(g, dtype=jnp.float32)[None, None, :]
        c = start[:, None, None] + (p + (i + 0.5) / g) * bin_sz[:, None, None]
        valid = ((c >= -1.0) & (c <= size)).astype(jnp.float32)
        c0 = jnp.where(c <= 0.0, 0.0, c)
        lo0 = jnp.floor(c0).astype(jnp.int32)
        at_edge = lo0 >= size - 1
        lo = jnp.where(at_edge, size - 1, lo0)
        hi = jnp.where(at_edge, size - 1, lo0 + 1)
        c_eff = jnp.where(at_edge, jnp.float32(size - 1), c0)
        l = c_eff - lo.astype(jnp.float32)
        h = 1.0 - l
        wgt = jnp.stack([h, l], axis=-1) * valid[..., None]          # (N,res,g,2)
        idx = jnp.stack([lo, hi], axis=-1)                           # (N,res,g,2)
        oh = jax.nn.one_hot(idx, size, dtype=jnp.float32)            # (N,res,g,2,size)
        per_sample = jnp.sum(wgt[..., None] * oh, axis=-2)           # (N,res,g,size)
        return jnp.sum(per_sample, axis=2)                           # (N,res,size)

    Ry = axis_weights(y1, bin_h, H)   # (N, res, H)
    Cx = axis_weights(x1, bin_w, W)   # (N, res, W)
    N = rois.shape[0]
    Wb = Ry[:, :, None, :, None] * Cx[:, None, :, None, :] / float(g * g)  # (N,res,res,H,W)
    return Wb.reshape(N, res * res, H * W)


def pack_roi_weights(roi_w, batch_ids, B, R, Tmax):
    """Group ROIs per image into tiles of R ROIs, rows ordered bin-major.
    batch_ids must be grouped/sorted per image (as convert_to_roi_format produces), and every
    image must have at most Tmax*R ROIs (otherwise the scatter silently drops the extras)."""
    N, res2, HW = roi_w.shape
    first = jnp.searchsorted(batch_ids, batch_ids, side="left").astype(jnp.int32)
    rank = jnp.arange(N, dtype=jnp.int32) - first                 # rank within its image
    tile = rank // R
    slot = rank % R
    packed = jnp.zeros((B, Tmax, R, res2, HW), roi_w.dtype)       # bf16 when roi_w is bf16
    packed = packed.at[batch_ids, tile, slot].set(roi_w)
    packed = jnp.swapaxes(packed, 2, 3).reshape(B, Tmax, res2 * R, HW)  # row = bin*R + slot
    row_index = (batch_ids.astype(jnp.int32) * Tmax + tile) * R + slot  # rows in flattened output
    return packed, row_index


# ===================================== parameter init =====================================
def init_params(key, dim_in, hidden, num_classes):
    k1, k2, k3 = jax.random.split(key, 3)

    def kaiming_uniform(k, fan_in, shape):
        # nn.init.kaiming_uniform_(w, a=1): bound = sqrt(3 / fan_in)
        bound = (3.0 / fan_in) ** 0.5
        return jax.random.uniform(k, shape, jnp.float32, -bound, bound)

    return dict(
        w1=kaiming_uniform(k1, dim_in, (dim_in, hidden)),
        b1=jnp.zeros((1, hidden), jnp.float32),
        w2=kaiming_uniform(k2, hidden, (hidden, hidden)),
        b2=jnp.zeros((1, hidden), jnp.float32),
        wc=0.01 * jax.random.normal(k3, (hidden, num_classes), dtype=jnp.float32),
        bc=jnp.zeros((1, num_classes), jnp.float32),
    )


# ===================================== full forward =====================================
def roi_action_head_forward(slow_features, fast_features, box_tensors, batch_ids, params,
                            max_rois_per_image):
    """slow/fast_features: NCTHW f32; box_tensors: (N,4) xyxy; batch_ids: (N,) int32 grouped
    per image; max_rois_per_image: static python int."""
    B, Cs, Ts, H, W = slow_features.shape
    _, Cf, Tf, _, _ = fast_features.shape
    C = Cs + Cf

    # --- temporal mean (MEAN_BEFORE_POOLER), emitted directly in (B, HW, C) lane-dense layout ---
    slow_mean = temporal_mean_transposed(slow_features)     # (B, HW, Cs) bf16  (Pallas)
    fast_mean = temporal_mean_transposed(fast_features)     # (B, HW, Cf) bf16  (Pallas)
    feat = jnp.concatenate([slow_mean, fast_mean], axis=-1)  # (B, HW, C) bf16 (no swapaxes pass)

    # --- box.extend(cfg.TEST.EXTEND_SCALE) (BoxList.extend, TO_REMOVE=1) ---
    xs, ys = TEST_EXTEND_SCALE
    x1, y1, x2, y2 = (box_tensors[:, i] for i in range(4))
    bw, bh = x2 - x1 + 1.0, y2 - y1 + 1.0
    padw, padh = xs * bw / 2.0, ys * bh / 2.0
    rois = jnp.stack([x1 - padw, y1 - padh, x2 + padw, y2 + padh], axis=1)

    # --- ROIAlign3d bilinear weights (bf16 from the start), packed per image into ROI tiles ---
    R = ROI_TILE
    Tmax = -(-int(max_rois_per_image) // R)
    roi_w = build_roi_align_weights(rois, H, W, POOLER_RESOLUTION, POOLER_SCALE,
                                    SAMPLING_RATIO).astype(jnp.bfloat16)
    packed_w, row_index = pack_roi_weights(roi_w, batch_ids, B, R, Tmax)

    # --- fused ROIAlign + MaxPool3d + fc1/relu/fc2/relu/cls_score + softmax/sigmoid ---
    pooled, prob = roi_pool_and_head(feat, packed_w, params, R)          # Pallas
    K = prob.shape[-1]
    person_pooled = jnp.take(pooled.reshape(B * Tmax * R, C), row_index, axis=0)  # (N, C)
    action_prob = jnp.take(prob.reshape(B * Tmax * R, K), row_index, axis=0)      # (N, K)

    # person_pooled in torch is (N, C, 1, 1, 1)
    pooled_5d = person_pooled.reshape(person_pooled.shape[0], C, 1, 1, 1)
    return action_prob, pooled_5d
    # TODO(synk): IA_STRUCTURE (interaction aggregation transformer), the object branch,
    # memory-feature fetching and BoxList bookkeeping are Python/object-level logic and are not
    # part of the kernel path.


if __name__ == "__main__":
    key = jax.random.PRNGKey(0)
    kslow, kfast, kparams = jax.random.split(key, 3)

    # image 64x64, feature stride 4 -> H=W=16; slow T=4, fast T=16; Cs=Cf=8
    B, Cs, Cf, Ts, Tf, H, W = 2, 8, 8, 4, 16, 16, 16
    slow = jax.random.normal(kslow, (B, Cs, Ts, H, W), dtype=jnp.float32)
    fast = jax.random.normal(kfast, (B, Cf, Tf, H, W), dtype=jnp.float32)

    # 2 boxes in image 0, 1 box in image 1 (xyxy in 64x64 image coords), grouped per image
    box_tensors = jnp.array([[4.0, 6.0, 40.0, 50.0],
                             [10.0, 12.0, 30.0, 44.0],
                             [8.0, 2.0, 56.0, 60.0]], dtype=jnp.float32)
    batch_ids = jnp.array([0, 0, 1], dtype=jnp.int32)
    boxes_per_image = [2, 1]

    params = init_params(kparams, Cs + Cf, MLP_HEAD_DIM, NUM_CLASSES)

    fwd = jax.jit(roi_action_head_forward, static_argnums=(5,))
    action_prob, pooled = fwd(slow, fast, box_tensors, batch_ids, params,
                              max(boxes_per_image))
    action_prob = jax.block_until_ready(action_prob)
    pooled = jax.block_until_ready(pooled)

    # PostProcessor: split per image into (boxes, scores) pairs (BoxList stand-in)
    results, start = [], 0
    for n in boxes_per_image:
        results.append((box_tensors[start:start + n], action_prob[start:start + n]))
        start += n

    assert action_prob.shape == (3, NUM_CLASSES)
    assert pooled.shape == (3, Cs + Cf, 1, 1, 1)
    assert bool(jnp.all(jnp.isfinite(action_prob)))
    print("KERNEL_OK")
</pallas_src>

<mosaic_0001>
module attributes {stable_mosaic.version = 11 : i64} {
  func.func @_temporal_mean_kernel(%arg0: i32, %arg1: i32, %arg2: memref<1x8x16x256xf32, #tpu.memory_space<vmem>>, %arg3: memref<1x256x8xbf16, #tpu.memory_space<vmem>>) attributes {dimension_semantics = [#tpu.dimension_semantics<parallel>, #tpu.dimension_semantics<parallel>], iteration_bounds = array<i64: 2, 1>, scalar_prefetch = 0 : i64, scratch_operands = 0 : i64, tpu.core_type = #tpu.core_type<tc>, window_params = [{transform_indices = @transform_0, window_bounds = array<i64: 1, 8, 16, 256>}, {transform_indices = @transform_1, window_bounds = array<i64: 1, 256, 8>}]} {
    %c0 = arith.constant 0 : index
    %c0_0 = arith.constant 0 : index
    %c0_1 = arith.constant 0 : index
    %c0_2 = arith.constant 0 : index
    %0 = vector.load %arg2[%c0, %c0_0, %c0_1, %c0_2] : memref<1x8x16x256xf32, #tpu.memory_space<vmem>>, vector<1x8x16x256xf32>
    %cst = arith.constant dense<0.000000e+00> : vector<1x8x256xf32>
    %1 = vector.multi_reduction <add>, %0, %cst [2] : vector<1x8x16x256xf32> to vector<1x8x256xf32>
    %cst_3 = arith.constant 1.600000e+01 : f32
    %2 = vector.broadcast %cst_3 : f32 to vector<1x8x256xf32>
    %3 = arith.divf %1, %2 : vector<1x8x256xf32>
    %4 = vector.shape_cast %3 : vector<1x8x256xf32> to vector<8x256xf32>
    %5 = tpu.transpose %4, [1, 0] : vector<8x256xf32> -> vector<256x8xf32>
    %6 = arith.truncf %5 : vector<256x8xf32> to vector<256x8xbf16>
    %c0_4 = arith.constant 0 : index
    %c0_5 = arith.constant 0 : index
    %c0_6 = arith.constant 0 : index
    %7 = vector.load %arg3[%c0_4, %c0_5, %c0_6] : memref<1x256x8xbf16, #tpu.memory_space<vmem>>, vector<1x256x8xbf16>
    %8 = vector.shape_cast %7 : vector<1x256x8xbf16> to vector<256x8xbf16>
    %9 = vector.shape_cast %6 : vector<256x8xbf16> to vector<1x256x8xbf16>
    tpu.vector_store %arg3[%c0_4, %c0_5, %c0_6], %9 {strides = array<i32>} : memref<1x256x8xbf16, #tpu.memory_space<vmem>>, vector<1x256x8xbf16>,
    return
  }
  func.func @transform_0(%arg0: i32, %arg1: i32) -> (i32, i32, i32, i32) {
    %c0_i32 = arith.constant 0 : i32
    %c0_i32_0 = arith.constant 0 : i32
    %c0_i32_1 = arith.constant 0 : i32
    return %arg0, %arg1, %c0_i32, %c0_i32_0 : i32, i32, i32, i32
  }
  func.func @transform_1(%arg0: i32, %arg1: i32) -> (i32, i32, i32) {
    %c0_i32 = arith.constant 0 : i32
    %c0_i32_0 = arith.constant 0 : i32
    return %arg0, %c0_i32, %arg1 : i32, i32, i32
  }
}

module attributes {stable_mosaic.version = 11 : i64} {
  func.func @_temporal_mean_kernel(%arg0: i32, %arg1: i32, %arg2: memref<1x8x4x256xf32, #tpu.memory_space<vmem>>, %arg3: memref<1x256x8xbf16, #tpu.memory_space<vmem>>) attributes {dimension_semantics = [#tpu.dimension_semantics<parallel>, #tpu.dimension_semantics<parallel>], iteration_bounds = array<i64: 2, 1>, scalar_prefetch = 0 : i64, scratch_operands = 0 : i64, tpu.core_type = #tpu.core_type<tc>, window_params = [{transform_indices = @transform_0, window_bounds = array<i64: 1, 8, 4, 256>}, {transform_indices = @transform_1, window_bounds = array<i64: 1, 256, 8>}]} {
    %c0 = arith.constant 0 : index
    %c0_0 = arith.constant 0 : index
    %c0_1 = arith.constant 0 : index
    %c0_2 = arith.constant 0 : index
    %0 = vector.load %arg2[%c0, %c0_0, %c0_1, %c0_2] : memref<1x8x4x256xf32, #tpu.memory_space<vmem>>, vector<1x8x4x256xf32>
    %cst = arith.constant dense<0.000000e+00> : vector<1x8x256xf32>
    %1 = vector.multi_reduction <add>, %0, %cst [2] : vector<1x8x4x256xf32> to vector<1x8x256xf32>
    %cst_3 = arith.constant 4.000000e+00 : f32
    %2 = vector.broadcast %cst_3 : f32 to vector<1x8x256xf32>
    %3 = arith.divf %1, %2 : vector<1x8x256xf32>
    %4 = vector.shape_cast %3 : vector<1x8x256xf32> to vector<8x256xf32>
    %5 = tpu.transpose %4, [1, 0] : vector<8x256xf32> -> vector<256x8xf32>
    %6 = arith.truncf %5 : vector<256x8xf32> to vector<256x8xbf16>
    %c0_4 = arith.constant 0 : index
    %c0_5 = arith.constant 0 : index
    %c0_6 = arith.constant 0 : index
    %7 = vector.load %arg3[%c0_4, %c0_5, %c0_6] : memref<1x256x8xbf16, #tpu.memory_space<vmem>>, vector<1x256x8xbf16>
    %8 = vector.shape_cast %7 : vector<1x256x8xbf16> to vector<256x8xbf16>
    %9 = vector.shape_cast %6 : vector<256x8xbf16> to vector<1x256x8xbf16>
    tpu.vector_store %arg3[%c0_4, %c0_5, %c0_6], %9 {strides = array<i32>} : memref<1x256x8xbf16, #tpu.memory_space<vmem>>, vector<1x256x8xbf16>,
    return
  }
  func.func @transform_0(%arg0: i32, %arg1: i32) -> (i32, i32, i32, i32) {
    %c0_i32 = arith.constant 0 : i32
    %c0_i32_0 = arith.constant 0 : i32
    %c0_i32_1 = arith.constant 0 : i32
    return %arg0, %arg1, %c0_i32, %c0_i32_0 : i32, i32, i32, i32
  }
  func.func @transform_1(%arg0: i32, %arg1: i32) -> (i32, i32, i32) {
    %c0_i32 = arith.constant 0 : i32
    %c0_i32_0 = arith.constant 0 : i32
    return %arg0, %c0_i32, %arg1 : i32, i32, i32
  }
}

module attributes {stable_mosaic.version = 11 : i64} {
  func.func @_roi_head_kernel(%arg0: i32, %arg1: i32, %arg2: memref<1x1x256x256xbf16, #tpu.memory_space<vmem>>, %arg3: memref<1x256x16xbf16, #tpu.memory_space<vmem>>, %arg4: memref<16x32xbf16, #tpu.memory_space<vmem>>, %arg5: memref<1x32xf32, #tpu.memory_space<vmem>>, %arg6: memref<32x32xbf16, #tpu.memory_space<vmem>>, %arg7: memref<1x32xf32, #tpu.memory_space<vmem>>, %arg8: memref<32x16xbf16, #tpu.memory_space<vmem>>, %arg9: memref<1x16xf32, #tpu.memory_space<vmem>>, %arg10: memref<1x1x16x16xf32, #tpu.memory_space<vmem>>, %arg11: memref<1x1x16x16xf32, #tpu.memory_space<vmem>>) attributes {dimension_semantics = [#tpu.dimension_semantics<parallel>, #tpu.dimension_semantics<arbitrary>], iteration_bounds = array<i64: 2, 1>, scalar_prefetch = 0 : i64, scratch_operands = 0 : i64, tpu.core_type = #tpu.core_type<tc>, window_params = [{transform_indices = @transform_0, window_bounds = array<i64: 1, 1, 256, 256>}, {transform_indices = @transform_1, window_bounds = array<i64: 1, 256, 16>}, {pipeline_mode = #tpu.pipeline_mode<synchronous>, transform_indices = @transform_2, window_bounds = array<i64: 16, 32>}, {pipeline_mode = #tpu.pipeline_mode<synchronous>, transform_indices = @transform_3, window_bounds = array<i64: 1, 32>}, {pipeline_mode = #tpu.pipeline_mode<synchronous>, transform_indices = @transform_4, window_bounds = array<i64: 32, 32>}, {pipeline_mode = #tpu.pipeline_mode<synchronous>, transform_indices = @transform_5, window_bounds = array<i64: 1, 32>}, {pipeline_mode = #tpu.pipeline_mode<synchronous>, transform_indices = @transform_6, window_bounds = array<i64: 32, 16>}, {pipeline_mode = #tpu.pipeline_mode<synchronous>, transform_indices = @transform_7, window_bounds = array<i64: 1, 16>}, {transform_indices = @transform_8, window_bounds = array<i64: 1, 1, 16, 16>}, {transform_indices = @transform_9, window_bounds = array<i64: 1, 1, 16, 16>}]} {
    %c0 = arith.constant 0 : index
    %c0_0 = arith.constant 0 : index
    %c0_1 = arith.constant 0 : index
    %c0_2 = arith.constant 0 : index
    %0 = vector.load %arg2[%c0, %c0_0, %c0_1, %c0_2] : memref<1x1x256x256xbf16, #tpu.memory_space<vmem>>, vector<1x1x256x256xbf16>
    %1 = vector.shape_cast %0 : vector<1x1x256x256xbf16> to vector<256x256xbf16>
    %c0_3 = arith.constant 0 : index
    %c0_4 = arith.constant 0 : index
    %c0_5 = arith.constant 0 : index
    %2 = vector.load %arg3[%c0_3, %c0_4, %c0_5] : memref<1x256x16xbf16, #tpu.memory_space<vmem>>, vector<1x256x16xbf16>
    %3 = vector.shape_cast %2 : vector<1x256x16xbf16> to vector<256x16xbf16>
    %cst = arith.constant dense<0.000000e+00> : vector<256x16xf32>
    %4 = tpu.matmul %1, %3, %cst {dimension_numbers = #tpu.dot_dimension_numbers<[1], [0], [0], [1], [0, 0, 1, 1], [], []>} : vector<256x256xbf16>, vector<256x16xbf16>, vector<256x16xf32> -> vector<256x16xf32>
    %5 = vector.extract_strided_slice %4 {offsets = [0, 0], sizes = [16, 16], strides = [1, 1]} : vector<256x16xf32> to vector<16x16xf32>
    %6 = vector.extract_strided_slice %4 {offsets = [16, 0], sizes = [16, 16], strides = [1, 1]} : vector<256x16xf32> to vector<16x16xf32>
    %7 = arith.maximumf %5, %6 : vector<16x16xf32>
    %8 = vector.extract_strided_slice %4 {offsets = [32, 0], sizes = [16, 16], strides = [1, 1]} : vector<256x16xf32> to vector<16x16xf32>
    %9 = arith.maximumf %7, %8 : vector<16x16xf32>
    %10 = vector.extract_strided_slice %4 {offsets = [48, 0], sizes = [16, 16], strides = [1, 1]} : vector<256x16xf32> to vector<16x16xf32>
    %11 = arith.maximumf %9, %10 : vector<16x16xf32>
    %12 = vector.extract_strided_slice %4 {offsets = [64, 0], sizes = [16, 16], strides = [1, 1]} : vector<256x16xf32> to vector<16x16xf32>
    %13 = arith.maximumf %11, %12 : vector<16x16xf32>
    %14 = vector.extract_strided_slice %4 {offsets = [80, 0], sizes = [16, 16], strides = [1, 1]} : vector<256x16xf32> to vector<16x16xf32>
    %15 = arith.maximumf %13, %14 : vector<16x16xf32>
    %16 = vector.extract_strided_slice %4 {offsets = [96, 0], sizes = [16, 16], strides = [1, 1]} : vector<256x16xf32> to vector<16x16xf32>
    %17 = arith.maximumf %15, %16 : vector<16x16xf32>
    %18 = vector.extract_strided_slice %4 {offsets = [112, 0], sizes = [16, 16], strides = [1, 1]} : vector<256x16xf32> to vector<16x16xf32>
    %19 = arith.maximumf %17, %18 : vector<16x16xf32>
    %20 = vector.extract_strided_slice %4 {offsets = [128, 0], sizes = [16, 16], strides = [1, 1]} : vector<256x16xf32> to vector<16x16xf32>
    %21 = arith.maximumf %19, %20 : vector<16x16xf32>
    %22 = vector.extract_strided_slice %4 {offsets = [144, 0], sizes = [16, 16], strides = [1, 1]} : vector<256x16xf32> to vector<16x16xf32>
    %23 = arith.maximumf %21, %22 : vector<16x16xf32>
    %24 = vector.extract_strided_slice %4 {offsets = [160, 0], sizes = [16, 16], strides = [1, 1]} : vector<256x16xf32> to vector<16x16xf32>
    %25 = arith.maximumf %23, %24 : vector<16x16xf32>
    %26 = vector.extract_strided_slice %4 {offsets = [176, 0], sizes = [16, 16], strides = [1, 1]} : vector<256x16xf32> to vector<16x16xf32>
    %27 = arith.maximumf %25, %26 : vector<16x16xf32>
    %28 = vector.extract_strided_slice %4 {offsets = [192, 0], sizes = [16, 16], strides = [1, 1]} : vector<256x16xf32> to vector<16x16xf32>
    %29 = arith.maximumf %27, %28 : vector<16x16xf32>
    %30 = vector.extract_strided_slice %4 {offsets = [208, 0], sizes = [16, 16], strides = [1, 1]} : vector<256x16xf32> to vector<16x16xf32>
    %31 = arith.maximumf %29, %30 : vector<16x16xf32>
    %32 = vector.extract_strided_slice %4 {offsets = [224, 0], sizes = [16, 16], strides = [1, 1]} : vector<256x16xf32> to vector<16x16xf32>
    %33 = arith.maximumf %31, %32 : vector<16x16xf32>
    %34 = vector.extract_strided_slice %4 {offsets = [240, 0], sizes = [16, 16], strides = [1, 1]} : vector<256x16xf32> to vector<16x16xf32>
    %35 = arith.maximumf %33, %34 : vector<16x16xf32>
    %36 = vector.shape_cast %35 : vector<16x16xf32> to vector<1x1x16x16xf32>
    %c0_6 = arith.constant 0 : index
    %c0_7 = arith.constant 0 : index
    %c0_8 = arith.constant 0 : index
    %c0_9 = arith.constant 0 : index
    %37 = vector.load %arg10[%c0_6, %c0_7, %c0_8, %c0_9] : memref<1x1x16x16xf32, #tpu.memory_space<vmem>>, vector<1x1x16x16xf32>
    tpu.vector_store %arg10[%c0_6, %c0_7, %c0_8, %c0_9], %36 {strides = array<i32>} : memref<1x1x16x16xf32, #tpu.memory_space<vmem>>, vector<1x1x16x16xf32>,
    %38 = arith.truncf %35 : vector<16x16xf32> to vector<16x16xbf16>
    %c0_10 = arith.constant 0 : index
    %c0_11 = arith.constant 0 : index
    %39 = vector.load %arg4[%c0_10, %c0_11] : memref<16x32xbf16, #tpu.memory_space<vmem>>, vector<16x32xbf16>
    %cst_12 = arith.constant dense<0.000000e+00> : vector<16x32xf32>
    %40 = tpu.matmul %38, %39, %cst_12 {dimension_numbers = #tpu.dot_dimension_numbers<[1], [0], [0], [1], [0, 0, 1, 1], [], []>} : vector<16x16xbf16>, vector<16x32xbf16>, vector<16x32xf32> -> vector<16x32xf32>
    %c0_13 = arith.constant 0 : index
    %c0_14 = arith.constant 0 : index
    %41 = vector.load %arg5[%c0_13, %c0_14] : memref<1x32xf32, #tpu.memory_space<vmem>>, vector<1x32xf32>
    %42 = vector.broadcast %41 : vector<1x32xf32> to vector<16x32xf32>
    %43 = arith.addf %40, %42 : vector<16x32xf32>
    %cst_15 = arith.constant 0.000000e+00 : f32
    %44 = vector.broadcast %cst_15 : f32 to vector<16x32xf32>
    %45 = arith.maximumf %43, %44 : vector<16x32xf32>
    %46 = arith.truncf %45 : vector<16x32xf32> to vector<16x32xbf16>
    %c0_16 = arith.constant 0 : index
    %c0_17 = arith.constant 0 : index
    %47 = vector.load %arg6[%c0_16, %c0_17] : memref<32x32xbf16, #tpu.memory_space<vmem>>, vector<32x32xbf16>
    %cst_18 = arith.constant dense<0.000000e+00> : vector<16x32xf32>
    %48 = tpu.matmul %46, %47, %cst_18 {dimension_numbers = #tpu.dot_dimension_numbers<[1], [0], [0], [1], [0, 0, 1, 1], [], []>} : vector<16x32xbf16>, vector<32x32xbf16>, vector<16x32xf32> -> vector<16x32xf32>
    %c0_19 = arith.constant 0 : index
    %c0_20 = arith.constant 0 : index
    %49 = vector.load %arg7[%c0_19, %c0_20] : memref<1x32xf32, #tpu.memory_space<vmem>>, vector<1x32xf32>
    %50 = vector.broadcast %49 : vector<1x32xf32> to vector<16x32xf32>
    %51 = arith.addf %48, %50 : vector<16x32xf32>
    %cst_21 = arith.constant 0.000000e+00 : f32
    %52 = vector.broadcast %cst_21 : f32 to vector<16x32xf32>
    %53 = arith.maximumf %51, %52 : vector<16x32xf32>
    %54 = arith.truncf %53 : vector<16x32xf32> to vector<16x32xbf16>
    %c0_22 = arith.constant 0 : index
    %c0_23 = arith.constant 0 : index
    %55 = vector.load %arg8[%c0_22, %c0_23] : memref<32x16xbf16, #tpu.memory_space<vmem>>, vector<32x16xbf16>
    %cst_24 = arith.constant dense<0.000000e+00> : vector<16x16xf32>
    %56 = tpu.matmul %54, %55, %cst_24 {dimension_numbers = #tpu.dot_dimension_numbers<[1], [0], [0], [1], [0, 0, 1, 1], [], []>} : vector<16x32xbf16>, vector<32x16xbf16>, vector<16x16xf32> -> vector<16x16xf32>
    %c0_25 = arith.constant 0 : index
    %c0_26 = arith.constant 0 : index
    %57 = vector.load %arg9[%c0_25, %c0_26] : memref<1x16xf32, #tpu.memory_space<vmem>>, vector<1x16xf32>
    %58 = vector.broadcast %57 : vector<1x16xf32> to vector<16x16xf32>
    %59 = arith.addf %56, %58 : vector<16x16xf32>
    %60 = tpu.iota {dimensions = array<i32: 1>} : vector<16x16xi32>
    %c6_i32 = arith.constant 6 : i32
    %61 = vector.broadcast %c6_i32 : i32 to vector<16x16xi32>
    %62 = arith.cmpi slt, %60, %61 : vector<16x16xi32>
    %cst_27 = arith.constant -3.40282347E+38 : f32
    %63 = vector.broadcast %cst_27 : f32 to vector<16x16xf32>
    %64 = arith.select %62, %59, %63 : vector<16x16xi1>, vector<16x16xf32>
    %cst_28 = arith.constant dense<0xFF800000> : vector<16xf32>
    %65 = vector.multi_reduction <maximumf>, %64, %cst_28 [1] : vector<16x16xf32> to vector<16xf32>
    %66 = vector.shape_cast %65 : vector<16xf32> to vector<16x1xf32>
    %67 = vector.broadcast %66 : vector<16x1xf32> to vector<16x16xf32>
    %68 = arith.subf %59, %67 : vector<16x16xf32>
    %69 = math.exp %68 : vector<16x16xf32>
    %cst_29 = arith.constant 0.000000e+00 : f32
    %70 = vector.broadcast %cst_29 : f32 to vector<16x16xf32>
    %71 = arith.select %62, %69, %70 : vector<16x16xi1>, vector<16x16xf32>
    %cst_30 = arith.constant dense<0.000000e+00> : vector<16xf32>
    %72 = vector.multi_reduction <add>, %71, %cst_30 [1] : vector<16x16xf32> to vector<16xf32>
    %73 = vector.shape_cast %72 : vector<16xf32> to vector<16x1xf32>
    %74 = tpu.reciprocal %73 {approx = true} : vector<16x1xf32> -> vector<16x1xf32>
    %75 = vector.broadcast %74 : vector<16x1xf32> to vector<16x16xf32>
    %76 = arith.mulf %71, %75 : vector<16x16xf32>
    %77 = arith.negf %59 : vector<16x16xf32>
    %78 = math.exp %77 : vector<16x16xf32>
    %cst_31 = arith.constant 1.000000e+00 : f32
    %79 = vector.broadcast %cst_31 : f32 to vector<16x16xf32>
    %80 = arith.addf %79, %78 : vector<16x16xf32>
    %81 = arith.divf %79, %80 : vector<16x16xf32>
    %82 = arith.select %62, %76, %81 : vector<16x16xi1>, vector<16x16xf32>
    %83 = vector.shape_cast %82 : vector<16x16xf32> to vector<1x1x16x16xf32>
    %c0_32 = arith.constant 0 : index
    %c0_33 = arith.constant 0 : index
    %c0_34 = arith.constant 0 : index
    %c0_35 = arith.constant 0 : index
    %84 = vector.load %arg11[%c0_32, %c0_33, %c0_34, %c0_35] : memref<1x1x16x16xf32, #tpu.memory_space<vmem>>, vector<1x1x16x16xf32>
    tpu.vector_store %arg11[%c0_32, %c0_33, %c0_34, %c0_35], %83 {strides = array<i32>} : memref<1x1x16x16xf32, #tpu.memory_space<vmem>>, vector<1x1x16x16xf32>,
    return
  }
  func.func @transform_0(%arg0: i32, %arg1: i32) -> (i32, i32, i32, i32) {
    %c0_i32 = arith.constant 0 : i32
    %c0_i32_0 = arith.constant 0 : i32
    %c0_i32_1 = arith.constant 0 : i32
    return %arg0, %arg1, %c0_i32, %c0_i32_0 : i32, i32, i32, i32
  }
  func.func @transform_1(%arg0: i32, %arg1: i32) -> (i32, i32, i32) {
    %c0_i32 = arith.constant 0 : i32
    %c0_i32_0 = arith.constant 0 : i32
    %c0_i32_1 = arith.constant 0 : i32
    return %arg0, %c0_i32, %c0_i32_0 : i32, i32, i32
  }
  func.func @transform_2(%arg0: i32, %arg1: i32) -> (i32, i32) {
    %c0_i32 = arith.constant 0 : i32
    %c0_i32_0 = arith.constant 0 : i32
    %c0_i32_1 = arith.constant 0 : i32
    return %c0_i32, %c0_i32_0 : i32, i32
  }
  func.func @transform_3(%arg0: i32, %arg1: i32) -> (i32, i32) {
    %c0_i32 = arith.constant 0 : i32
    %c0_i32_0 = arith.constant 0 : i32
    %c0_i32_1 = arith.constant 0 : i32
    return %c0_i32, %c0_i32_0 : i32, i32
  }
  func.func @transform_4(%arg0: i32, %arg1: i32) -> (i32, i32) {
    %c0_i32 = arith.constant 0 : i32
    %c0_i32_0 = arith.constant 0 : i32
    %c0_i32_1 = arith.constant 0 : i32
    return %c0_i32, %c0_i32_0 : i32, i32
  }
  func.func @transform_5(%arg0: i32, %arg1: i32) -> (i32, i32) {
    %c0_i32 = arith.constant 0 : i32
    %c0_i32_0 = arith.constant 0 : i32
    %c0_i32_1 = arith.constant 0 : i32
    return %c0_i32, %c0_i32_0 : i32, i32
  }
  func.func @transform_6(%arg0: i32, %arg1: i32) -> (i32, i32) {
    %c0_i32 = arith.constant 0 : i32
    %c0_i32_0 = arith.constant 0 : i32
    %c0_i32_1 = arith.constant 0 : i32
    return %c0_i32, %c0_i32_0 : i32, i32
  }
  func.func @transform_7(%arg0: i32, %arg1: i32) -> (i32, i32) {
    %c0_i32 = arith.constant 0 : i32
    %c0_i32_0 = arith.constant 0 : i32
    %c0_i32_1 = arith.constant 0 : i32
    return %c0_i32, %c0_i32_0 : i32, i32
  }
  func.func @transform_8(%arg0: i32, %arg1: i32) -> (i32, i32, i32, i32) {
    %c0_i32 = arith.constant 0 : i32
    %c0_i32_0 = arith.constant 0 : i32
    %c0_i32_1 = arith.constant 0 : i32
    return %arg0, %arg1, %c0_i32, %c0_i32_0 : i32, i32, i32, i32
  }
  func.func @transform_9(%arg0: i32, %arg1: i32) -> (i32, i32, i32, i32) {
    %c0_i32 = arith.constant 0 : i32
    %c0_i32_0 = arith.constant 0 : i32
    %c0_i32_1 = arith.constant 0 : i32
    return %arg0, %arg1, %c0_i32, %c0_i32_0 : i32, i32, i32, i32
  }
}

</mosaic_0001>

<bundles_post_ra>
// kernel: custom-call.2
= control target key start
LH: loop header
LB: loop body
LE: loop exit
PB: predicated region body
PF: predicated region fallthrough
CT: control target
= control target key end

     0   :  { %s6_s0 = inlined_call_operand.vmem [shape: u32[3], index: 0, kind: output, shape index: {}]  }

// kernel: roi_action_head_forward.4
= control target key start
LH: loop header
LB: loop body
LE: loop exit
PB: predicated region body
PF: predicated region fallthrough
CT: control target
= control target key end

     0   :  { %s735_s6 = smov 0   ;;  %s737_s7 = smov 0   ;;  %s921_s0 = inlined_call_operand.vmem [shape: f32[2,8,16,256], index: 0, kind: input, shape index: {}]   ;;  %s922_s1 = inlined_call_operand.vmem [shape: bf16[2,256,8], index: 1, kind: output, shape index: {}]  }
   0x1   :  { %s739_s8 = smov 0  }
   0x2 LB: > { %s23_s9 = sadd.s32 1, %s718_s7  ;;  %p581_p0 = scmp.ge.s32.totalorder %s722_s8, 1  ;;  %s722_s8 = sphi %s739_s8, %s11_s8   ;;  %s718_s7 = sphi %s737_s7, %s924_s7   ;;  %s714_s6 = sphi %s735_s6, %s923_s6  }
   0x3   : > { %p25_p1 = scmp.ge.s32.totalorder %s23_s9, 2  ;;  %p109_p2 = scmp.lt.s32.totalorder %s722_s8, 3 }
   0x5   : > { %s926_s9 = smov (%p25_p1, %s23_s9), 0  ;;  %p110_p3 = pnand %p581_p0, %p109_p2 }
   0x6   : > { %p138_p4 = scmp.lt.s32.totalorder (!%p110_p3), %s714_s6, 1 }
   0x7   : > { %113 = sbr.rel (%p110_p3) target bundleno = 351 (0x15f), region = 24 }
   0xc   : > { %s928_s6 = smov (!%p138_p4, %s714_s6), 1  ;;  %v724_v7 = vmov 16.0   ;;  %vm339_vm1 = vcmask 1041409   ;;  %vm341_vm2 = vcmask 1042434   ;;  %vm343_vm3 = vcmask 1043459  }
   0xd   : > { %s588_s10 = sshll.u32 %s928_s6, 8  ;;  %698 = vrcp.f32 %v724_v7  ;;  %vm345_vm4 = vcmask 1044484   ;;  %vm347_vm5 = vcmask 1045509   ;;  %vm349_vm6 = vcmask 1046534   ;;  %s589_s14 = sshll.u32 %s928_s6, 7 }
   0xe   : > { %s759_s13 = scalar_lea.vmem %s921_s0, %s588_s10  ;;  %vm351_vm7 = vcmask 1047559   ;;  %s846_s17 = scalar_lea.vmem %s922_s1, %s589_s14  ;;  %vm458_vm8 = vcmask 60416  }
   0xf   : > { %v156_v0 = vld [vmem:[%s759_s13] sm:$0xff]  ;;  %v157_v1 = vld [vmem:[%s759_s13 + $0x8] sm:$0xff]  ;;  %v158_v2 = vld [vmem:[%s759_s13 + $0x10] sm:$0xff] }
  0x10   : > { %v159_v3 = vld [vmem:[%s759_s13 + $0x18] sm:$0xff]  ;;  %v160_v4 = vld [vmem:[%s759_s13 + $0x20] sm:$0xff]  ;;  %v161_v5 = vld [vmem:[%s759_s13 + $0x28] sm:$0xff]  ;;  %v188_v6 = vadd.f32 %v158_v2, %v156_v0 }
  0x11   : > { %v162_v8 = vld [vmem:[%s759_s13 + $0x30] sm:$0xff]  ;;  %v163_v9 = vld [vmem:[%s759_s13 + $0x38] sm:$0xff]  ;;  %v164_v10 = vld [vmem:[%s759_s13 + $0x40] sm:$0xff]  ;;  %v195_v11 = vadd.f32 %v159_v3, %v157_v1 }
  0x12   : > { %v165_v12 = vld [vmem:[%s759_s13 + $0x48] sm:$0xff]  ;;  %v166_v13 = vld [vmem:[%s759_s13 + $0x50] sm:$0xff]  ;;  %v167_v14 = vld [vmem:[%s759_s13 + $0x58] sm:$0xff]  ;;  %v189_v15 = vrot.slane %v188_v6, 4  ;;  %v202_v16 = vadd.f32 %v162_v8, %v160_v4  ;;  %v209_v17 = vadd.f32 %v163_v9, %v161_v5 }
  0x13   : > { %v168_v18 = vld [vmem:[%s759_s13 + $0x60] sm:$0xff]  ;;  %v169_v19 = vld [vmem:[%s759_s13 + $0x68] sm:$0xff]  ;;  %v170_v20 = vld [vmem:[%s759_s13 + $0x70] sm:$0xff]  ;;  %v196_v21 = vrot.slane %v195_v11, 4  ;;  %v216_v22 = vadd.f32 %v166_v13, %v164_v10  ;;  %v223_v23 = vadd.f32 %v167_v14, %v165_v12  ;;  %v777_v33 = vpop.eup %698 }
  0x14   : > { %v171_v24 = vld [vmem:[%s759_s13 + $0x78] sm:$0xff]  ;;  %v190_v25 = vadd.f32 %v189_v15, %v188_v6  ;;  %v203_v26 = vrot.slane %v202_v16, 4  ;;  %v210_v27 = vrot.slane %v209_v17, 4  ;;  %v230_v28 = vadd.f32 %v170_v20, %v168_v18  ;;  %v172_v52 = vld [vmem:[%s759_s13 + $0x80] sm:$0xff]  ;;  %v173_v53 = vld [vmem:[%s759_s13 + $0x88] sm:$0xff] }
  0x15   : > { %v197_v29 = vadd.f32 %v196_v21, %v195_v11  ;;  %v217_v30 = vrot.slane %v216_v22, 4  ;;  %v224_v31 = vrot.slane %v223_v23, 4  ;;  %v237_v32 = vadd.f32 %v171_v24, %v169_v19  ;;  %v174_v54 = vld [vmem:[%s759_s13 + $0x90] sm:$0xff]  ;;  %v175_v58 = vld [vmem:[%s759_s13 + $0x98] sm:$0xff]  ;;  %v176_v59 = vld [vmem:[%s759_s13 + $0xa0] sm:$0xff] }
  0x16   : > { %v191_v34 = vrot.slane %v190_v25, 2  ;;  %v204_v35 = vadd.f32 %v203_v26, %v202_v16  ;;  %v211_v36 = vadd.f32 %v210_v27, %v209_v17  ;;  %v231_v37 = vrot.slane %v230_v28, 4  ;;  %v177_v60 = vld [vmem:[%s759_s13 + $0xa8] sm:$0xff]  ;;  %v178_v62 = vld [vmem:[%s759_s13 + $0xb0] sm:$0xff]  ;;  %v179_v63 = vld [vmem:[%s759_s13 + $0xb8] sm:$0xff] }
  0x17   : > { %v198_v38 = vrot.slane %v197_v29, 2  ;;  %v218_v39 = vadd.f32 %v217_v30, %v216_v22  ;;  %v225_v40 = vadd.f32 %v224_v31, %v223_v23  ;;  %v238_v41 = vrot.slane %v237_v32, 4  ;;  %v180_v0 = vld [vmem:[%s759_s13 + $0xc0] sm:$0xff]  ;;  %v181_v3 = vld [vmem:[%s759_s13 + $0xc8] sm:$0xff]  ;;  %v182_v4 = vld [vmem:[%s759_s13 + $0xd0] sm:$0xff] }
  0x18   : > { %v192_v42 = vadd.f32 %v191_v34, %v190_v25  ;;  %v205_v43 = vrot.slane %v204_v35, 2  ;;  %v212_v44 = vrot.slane %v211_v36, 2  ;;  %v232_v45 = vadd.f32 %v231_v37, %v230_v28  ;;  %v183_v5 = vld [vmem:[%s759_s13 + $0xd8] sm:$0xff]  ;;  %v184_v10 = vld [vmem:[%s759_s13 + $0xe0] sm:$0xff]  ;;  %v186_v11 = vld [vmem:[%s759_s13 + $0xf0] sm:$0xff] }
  0x19   : > { %v219_v46 = vrot.slane %v218_v39, 2  ;;  %v239_v47 = vadd.f32 %v238_v41, %v237_v32  ;;  %v780_v48 = vmul.f32 16.0, %v777_v33  ;;  %v782_v50 = vadd.f32 %v198_v38, %v197_v29  ;;  %v185_v16 = vld [vmem:[%s759_s13 + $0xe8] sm:$0xff]  ;;  %v187_v17 = vld [vmem:[%s759_s13 + $0xf8] sm:$0xff] }
  0x1a   : > { %v193_v49 = vrot.slane %v192_v42, 1  ;;  %v226_v51 = vrot.slane %v225_v40, 2  ;;  %v787_v55 = vadd.f32 %v205_v43, %v204_v35  ;;  %v789_v56 = vadd.f32 %v212_v44, %v211_v36 }
  0x1b   : > { %v233_v57 = vrot.slane %v232_v45, 2  ;;  %v794_v61 = vadd.f32 %v219_v46, %v218_v39  ;;  %v240_v1 = vrot.slane %v239_v47, 2  ;;  %v302_v2 = vsub.f32 1.0, %v780_v48 }
  0x1c   : > { %v803_v6 = vadd.f32 %v193_v49, %v192_v42  ;;  %v200_v7 = vrot.slane %v782_v50, 1  ;;  %v806_v8 = vadd.f32 %v226_v51, %v225_v40  ;;  %v244_v9 = vadd.f32 %v174_v54, %v172_v52 }
  0x1d   : > { %v207_v12 = vrot.slane %v787_v55, 1  ;;  %v214_v13 = vrot.slane %v789_v56, 1  ;;  %v234_v14 = vadd.f32 %v233_v57, %v232_v45  ;;  %v251_v15 = vadd.f32 %v175_v58, %v173_v53 }
  0x1e   : > { %v221_v18 = vrot.slane %v794_v61, 1  ;;  %v245_v19 = vrot.slane %v244_v9, 4  ;;  %v258_v20 = vadd.f32 %v178_v62, %v176_v59  ;;  %v265_v21 = vadd.f32 %v179_v63, %v177_v60 }
  0x1f   : > { %v241_v22 = vadd.f32 %v240_v1, %v239_v47  ;;  %v252_v23 = vrot.slane %v251_v15, 4  ;;  %v272_v24 = vadd.f32 %v182_v4, %v180_v0  ;;  %v279_v25 = vadd.f32 %v183_v5, %v181_v3 }
  0x20   : > { %v246_v26 = vadd.f32 %v245_v19, %v244_v9  ;;  %v259_v27 = vrot.slane %v258_v20, 4  ;;  %v266_v28 = vrot.slane %v265_v21, 4  ;;  %v286_v29 = vadd.f32 %v186_v11, %v184_v10 }
  0x21   : > { %v253_v30 = vadd.f32 %v252_v23, %v251_v15  ;;  %v273_v31 = vrot.slane %v272_v24, 4  ;;  %v280_v32 = vrot.slane %v279_v25, 4  ;;  %v293_v34 = vadd.f32 %v187_v17, %v185_v16 }
  0x22   : > { %v247_v35 = vrot.slane %v246_v26, 2  ;;  %v260_v36 = vadd.f32 %v259_v27, %v258_v20  ;;  %v267_v37 = vadd.f32 %v266_v28, %v265_v21  ;;  %v287_v38 = vrot.slane %v286_v29, 4 }
  0x23   : > { %v254_v39 = vrot.slane %v253_v30, 2  ;;  %v274_v40 = vadd.f32 %v273_v31, %v272_v24  ;;  %v281_v41 = vadd.f32 %v280_v32, %v279_v25  ;;  %v294_v42 = vrot.slane %v293_v34, 4 }
  0x24   : > { %vm305_vm0 = vweird.f32 %v777_v33  ;;  %v248_v43 = vadd.f32 %v247_v35, %v246_v26  ;;  %v261_v44 = vrot.slane %v260_v36, 2  ;;  %v268_v45 = vrot.slane %v267_v37, 2 }
  0x25   : > { %v288_v46 = vadd.f32 %v287_v38, %v286_v29  ;;  %v255_v47 = vadd.f32 %v254_v39, %v253_v30  ;;  %v275_v49 = vrot.slane %v274_v40, 2  ;;  %v282_v51 = vrot.slane %v281_v41, 2 }
  0x26   : > { %v295_v52 = vadd.f32 %v294_v42, %v293_v34  ;;  %v228_v53 = vrot.slane %v806_v8, 1  ;;  %v262_v54 = vadd.f32 %v261_v44, %v260_v36  ;;  %v269_v57 = vadd.f32 %v268_v45, %v267_v37 }
  0x27   : > { %v289_v58 = vrot.slane %v288_v46, 2  ;;  %v235_v59 = vrot.slane %v234_v14, 1  ;;  %v276_v60 = vadd.f32 %v275_v49, %v274_v40  ;;  %v283_v62 = vadd.f32 %v282_v51, %v281_v41 }
  0x28   : > { %v296_v63 = vrot.slane %v295_v52, 2  ;;  %v201_v0 = vadd.f32 %v200_v7, %v782_v50  ;;  %v242_v1 = vrot.slane %v241_v22, 1  ;;  %v249_v3 = vrot.slane %v248_v43, 1 }
  0x29   : > { %v290_v4 = vadd.f32 %v289_v58, %v288_v46  ;;  %v256_v5 = vrot.slane %v255_v47, 1  ;;  %v263_v9 = vrot.slane %v262_v54, 1  ;;  %v270_v10 = vrot.slane %v269_v57, 1 }
  0x2a   : > { %v297_v11 = vadd.f32 %v296_v63, %v295_v52  ;;  %v208_v15 = vadd.f32 %v207_v12, %v787_v55  ;;  %v277_v16 = vrot.slane %v276_v60, 1  ;;  %v284_v17 = vrot.slane %v283_v62, 1 }
  0x2b   : > { %v303_v19 = vmul.f32 %v777_v33, %v302_v2  ;;  %v215_v20 = vadd.f32 %v214_v13, %v789_v56  ;;  %v222_v50 = vadd.f32 %v221_v18, %v794_v61  ;;  %v229_v7 = vadd.f32 %v228_v53, %v806_v8 }
  0x2c   : > { %v236_v21 = vadd.f32 %v235_v59, %v234_v14  ;;  %v243_v23 = vadd.f32 %v242_v1, %v241_v22  ;;  %v250_v24 = vadd.f32 %v249_v3, %v248_v43  ;;  %v291_v25 = vrot.slane %v290_v4, 1 }
  0x2d   : > { %v304_v26 = vadd.f32 %v777_v33, %v303_v19  ;;  %v257_v27 = vadd.f32 %v256_v5, %v255_v47  ;;  %v264_v55 = vadd.f32 %v263_v9, %v262_v54  ;;  %v271_v12 = vadd.f32 %v270_v10, %v269_v57 }
  0x2e   : > { %v298_v28 = vrot.slane %v297_v11, 1  ;;  %v278_v29 = vadd.f32 %v277_v16, %v276_v60  ;;  %v285_v48 = vadd.f32 %v284_v17, %v283_v62  ;;  %v292_v14 = vadd.f32 %v291_v25, %v290_v4 }
  0x2f   : > { %v306_v56 = vsel %vm305_vm0, %v777_v33, %v304_v26 }
  0x30   : > { %v307_v61 = vmul.f32 %v306_v56, %v803_v6  ;;  %v308_v2 = vmul.f32 %v306_v56, %v201_v0  ;;  %v309_v8 = vmul.f32 %v306_v56, %v208_v15  ;;  %v310_v13 = vmul.f32 %v306_v56, %v215_v20 }
  0x31   : > { %v311_v18 = vmul.f32 %v306_v56, %v222_v50  ;;  %v312_v22 = vmul.f32 %v306_v56, %v229_v7  ;;  %v299_v30 = vadd.f32 %v298_v28, %v297_v11  ;;  %v313_v31 = vmul.f32 %v306_v56, %v236_v21 }
  0x32   : > { %v314_v32 = vmul.f32 %v306_v56, %v243_v23  ;;  %v315_v34 = vmul.f32 %v306_v56, %v250_v24  ;;  %v316_v35 = vmul.f32 %v306_v56, %v257_v27  ;;  %v317_v36 = vmul.f32 %v306_v56, %v264_v55 }
  0x33   : > { %v318_v33 = vmul.f32 %v306_v56, %v271_v12  ;;  %v340_v37 = vsel %vm339_vm1, %v309_v8, %v307_v61  ;;  %v353_v6 = vsel %vm339_vm1, %v310_v13, %v308_v2  ;;  %v319_v38 = vmul.f32 %v306_v56, %v278_v29 }
  0x34   : > { %v320_v39 = vmul.f32 %v306_v56, %v285_v48  ;;  %v342_v40 = vsel %vm341_vm2, %v311_v18, %v340_v37  ;;  %v354_v41 = vsel %vm341_vm2, %v312_v22, %v353_v6  ;;  %v321_v42 = vmul.f32 %v306_v56, %v292_v14 }
  0x35   : > { %v322_v43 = vmul.f32 %v306_v56, %v299_v30  ;;  %v344_v44 = vsel %vm343_vm3, %v313_v31, %v342_v40  ;;  %v355_v45 = vsel %vm343_vm3, %v314_v32, %v354_v41 }
  0x36   : > { %v346_v46 = vsel %vm345_vm4, %v315_v34, %v344_v44  ;;  %v356_v47 = vsel %vm345_vm4, %v316_v35, %v355_v45 }
  0x37   : > { %v348_v49 = vsel %vm347_vm5, %v317_v36, %v346_v46  ;;  %v357_v51 = vsel %vm347_vm5, %v318_v33, %v356_v47 }
  0x38   : > { %v350_v52 = vsel %vm349_vm6, %v319_v38, %v348_v49  ;;  %v358_v53 = vsel %vm349_vm6, %v320_v39, %v357_v51 }
  0x39   : > { %v352_v54 = vsel %vm351_vm7, %v321_v42, %v350_v52  ;;  %v359_v57 = vsel %vm351_vm7, %v322_v43, %v358_v53 }
  0x3a   : > { %v616_v58 = vpack.i.bf16 %v359_v57, %v352_v54 }
  0x3c   : > { %617 = vxpose.xlu0.b32.start.end [1/1] (short) %v616_v58, 128 }
  0xe0   : > { %v618_v59 = vpop.trf.xlu0 }
  0xe1   : > { %v622_v60 = vunpack.i.h.bf16 %v618_v59  ;;  %v619_v62 = vunpack.i.l.bf16 %v618_v59 }
  0xe3   : > { %v442_v63 = vpack.c.bf16 %v622_v60, %v622_v60  ;;  %v426_v0 = vpack.c.bf16 %v619_v62, %v619_v62 }
  0xe5   : > { %475 = vst.msk [vmem:[%s846_s17 + $0x40] sm:$0xf] %vm458_vm8, %v442_v63 }
  0xe6   : > { %459 = vst.msk [vmem:[%s846_s17] sm:$0xf] %vm458_vm8, %v426_v0 }
  0xe8   : > { %v623_v1 = vpop.trf.xlu0 }
  0xe9   : > { %v627_v3 = vunpack.i.h.bf16 %v623_v1  ;;  %v624_v4 = vunpack.i.l.bf16 %v623_v1 }
  0xeb   : > { %v443_v5 = vpack.c.bf16 %v627_v3, %v627_v3  ;;  %v427_v9 = vpack.c.bf16 %v624_v4, %v624_v4 }
  0xed   : > { %476 = vst.msk [vmem:[%s846_s17 + $0x44] sm:$0xf] %vm458_vm8, %v443_v5 }
  0xee   : > { %460 = vst.msk [vmem:[%s846_s17 + $0x4] sm:$0xf] %vm458_vm8, %v427_v9 }
  0xf0   : > { %v628_v10 = vpop.trf.xlu0 }
  0xf1   : > { %v632_v11 = vunpack.i.h.bf16 %v628_v10  ;;  %v629_v15 = vunpack.i.l.bf16 %v628_v10 }
  0xf3   : > { %v444_v16 = vpack.c.bf16 %v632_v11, %v632_v11  ;;  %v428_v17 = vpack.c.bf16 %v629_v15, %v629_v15 }
  0xf5   : > { %477 = vst.msk [vmem:[%s846_s17 + $0x48] sm:$0xf] %vm458_vm8, %v444_v16 }
  0xf6   : > { %461 = vst.msk [vmem:[%s846_s17 + $0x8] sm:$0xf] %vm458_vm8, %v428_v17 }
  0xf8   : > { %v633_v19 = vpop.trf.xlu0 }
  0xf9   : > { %v637_v20 = vunpack.i.h.bf16 %v633_v19  ;;  %v634_v50 = vunpack.i.l.bf16 %v633_v19 }
  0xfb   : > { %v445_v7 = vpack.c.bf16 %v637_v20, %v637_v20  ;;  %v429_v21 = vpack.c.bf16 %v634_v50, %v634_v50 }
  0xfd   : > { %478 = vst.msk [vmem:[%s846_s17 + $0x4c] sm:$0xf] %vm458_vm8, %v445_v7 }
  0xfe   : > { %462 = vst.msk [vmem:[%s846_s17 + $0xc] sm:$0xf] %vm458_vm8, %v429_v21 }
 0x100   : > { %v638_v23 = vpop.trf.xlu0 }
 0x101   : > { %v642_v24 = vunpack.i.h.bf16 %v638_v23  ;;  %v639_v25 = vunpack.i.l.bf16 %v638_v23 }
 0x103   : > { %v446_v26 = vpack.c.bf16 %v642_v24, %v642_v24  ;;  %v430_v27 = vpack.c.bf16 %v639_v25, %v639_v25 }
 0x105   : > { %479 = vst.msk [vmem:[%s846_s17 + $0x50] sm:$0xf] %vm458_vm8, %v446_v26 }
 0x106   : > { %463 = vst.msk [vmem:[%s846_s17 + $0x10] sm:$0xf] %vm458_vm8, %v430_v27 }
 0x108   : > { %v643_v55 = vpop.trf.xlu0 }
 0x109   : > { %v647_v12 = vunpack.i.h.bf16 %v643_v55  ;;  %v644_v28 = vunpack.i.l.bf16 %v643_v55 }
 0x10b   : > { %v447_v29 = vpack.c.bf16 %v647_v12, %v647_v12  ;;  %v431_v48 = vpack.c.bf16 %v644_v28, %v644_v28 }
 0x10d   : > { %480 = vst.msk [vmem:[%s846_s17 + $0x54] sm:$0xf] %vm458_vm8, %v447_v29 }
 0x10e   : > { %464 = vst.msk [vmem:[%s846_s17 + $0x14] sm:$0xf] %vm458_vm8, %v431_v48 }
 0x110   : > { %v648_v56 = vpop.trf.xlu0 }
 0x111   : > { %v652_v61 = vunpack.i.h.bf16 %v648_v56  ;;  %v649_v2 = vunpack.i.l.bf16 %v648_v56 }
 0x113   : > { %v448_v8 = vpack.c.bf16 %v652_v61, %v652_v61  ;;  %v432_v13 = vpack.c.bf16 %v649_v2, %v649_v2 }
 0x115   : > { %481 = vst.msk [vmem:[%s846_s17 + $0x58] sm:$0xf] %vm458_vm8, %v448_v8 }
 0x116   : > { %465 = vst.msk [vmem:[%s846_s17 + $0x18] sm:$0xf] %vm458_vm8, %v432_v13 }
 0x118   : > { %v653_v14 = vpop.trf.xlu0 }
 0x119   : > { %v657_v18 = vunpack.i.h.bf16 %v653_v14  ;;  %v654_v22 = vunpack.i.l.bf16 %v653_v14 }
 0x11b   : > { %v449_v30 = vpack.c.bf16 %v657_v18, %v657_v18  ;;  %v433_v31 = vpack.c.bf16 %v654_v22, %v654_v22 }
 0x11d   : > { %482 = vst.msk [vmem:[%s846_s17 + $0x5c] sm:$0xf] %vm458_vm8, %v449_v30 }
 0x11e   : > { %466 = vst.msk [vmem:[%s846_s17 + $0x1c] sm:$0xf] %vm458_vm8, %v433_v31 }
 0x120   : > { %v658_v32 = vpop.trf.xlu0 }
 0x121   : > { %v662_v34 = vunpack.i.h.bf16 %v658_v32  ;;  %v659_v35 = vunpack.i.l.bf16 %v658_v32 }
 0x123   : > { %v450_v36 = vpack.c.bf16 %v662_v34, %v662_v34  ;;  %v434_v33 = vpack.c.bf16 %v659_v35, %v659_v35 }
 0x125   : > { %483 = vst.msk [vmem:[%s846_s17 + $0x60] sm:$0xf] %vm458_vm8, %v450_v36 }
 0x126   : > { %467 = vst.msk [vmem:[%s846_s17 + $0x20] sm:$0xf] %vm458_vm8, %v434_v33 }
 0x128   : > { %v663_v37 = vpop.trf.xlu0 }
 0x129   : > { %v667_v6 = vunpack.i.h.bf16 %v663_v37  ;;  %v664_v38 = vunpack.i.l.bf16 %v663_v37 }
 0x12b   : > { %v451_v39 = vpack.c.bf16 %v667_v6, %v667_v6  ;;  %v435_v40 = vpack.c.bf16 %v664_v38, %v664_v38 }
 0x12d   : > { %484 = vst.msk [vmem:[%s846_s17 + $0x64] sm:$0xf] %vm458_vm8, %v451_v39 }
 0x12e   : > { %468 = vst.msk [vmem:[%s846_s17 + $0x24] sm:$0xf] %vm458_vm8, %v435_v40 }
 0x130   : > { %v668_v41 = vpop.trf.xlu0 }
 0x131   : > { %v672_v42 = vunpack.i.h.bf16 %v668_v41  ;;  %v669_v43 = vunpack.i.l.bf16 %v668_v41 }
 0x133   : > { %v452_v44 = vpack.c.bf16 %v672_v42, %v672_v42  ;;  %v436_v45 = vpack.c.bf16 %v669_v43, %v669_v43 }
 0x135   : > { %485 = vst.msk [vmem:[%s846_s17 + $0x68] sm:$0xf] %vm458_vm8, %v452_v44 }
 0x136   : > { %469 = vst.msk [vmem:[%s846_s17 + $0x28] sm:$0xf] %vm458_vm8, %v436_v45 }
 0x138   : > { %v673_v46 = vpop.trf.xlu0 }
 0x139   : > { %v677_v47 = vunpack.i.h.bf16 %v673_v46  ;;  %v674_v49 = vunpack.i.l.bf16 %v673_v46 }
 0x13b   : > { %v453_v51 = vpack.c.bf16 %v677_v47, %v677_v47  ;;  %v437_v52 = vpack.c.bf16 %v674_v49, %v674_v49 }
 0x13d   : > { %486 = vst.msk [vmem:[%s846_s17 + $0x6c] sm:$0xf] %vm458_vm8, %v453_v51 }
 0x13e   : > { %470 = vst.msk [vmem:[%s846_s17 + $0x2c] sm:$0xf] %vm458_vm8, %v437_v52 }
 0x140   : > { %v678_v53 = vpop.trf.xlu0 }
 0x141   : > { %v682_v54 = vunpack.i.h.bf16 %v678_v53  ;;  %v679_v57 = vunpack.i.l.bf16 %v678_v53 }
 0x143   : > { %v454_v58 = vpack.c.bf16 %v682_v54, %v682_v54  ;;  %v438_v59 = vpack.c.bf16 %v679_v57, %v679_v57 }
 0x145   : > { %487 = vst.msk [vmem:[%s846_s17 + $0x70] sm:$0xf] %vm458_vm8, %v454_v58 }
 0x146   : > { %471 = vst.msk [vmem:[%s846_s17 + $0x30] sm:$0xf] %vm458_vm8, %v438_v59 }
 0x148   : > { %v683_v60 = vpop.trf.xlu0 }
 0x149   : > { %v687_v62 = vunpack.i.h.bf16 %v683_v60  ;;  %v684_v63 = vunpack.i.l.bf16 %v683_v60 }
 0x14b   : > { %v455_v0 = vpack.c.bf16 %v687_v62, %v687_v62  ;;  %v439_v1 = vpack.c.bf16 %v684_v63, %v684_v63 }
 0x14d   : > { %488 = vst.msk [vmem:[%s846_s17 + $0x74] sm:$0xf] %vm458_vm8, %v455_v0 }
 0x14e   : > { %472 = vst.msk [vmem:[%s846_s17 + $0x34] sm:$0xf] %vm458_vm8, %v439_v1 }
 0x150   : > { %v688_v3 = vpop.trf.xlu0 }
 0x151   : > { %v692_v4 = vunpack.i.h.bf16 %v688_v3  ;;  %v689_v5 = vunpack.i.l.bf16 %v688_v3 }
 0x153   : > { %v456_v9 = vpack.c.bf16 %v692_v4, %v692_v4  ;;  %v440_v10 = vpack.c.bf16 %v689_v5, %v689_v5 }
 0x155   : > { %489 = vst.msk [vmem:[%s846_s17 + $0x78] sm:$0xf] %vm458_vm8, %v456_v9 }
 0x156   : > { %473 = vst.msk [vmem:[%s846_s17 + $0x38] sm:$0xf] %vm458_vm8, %v440_v10 }
 0x158   : > { %v693_v11 = vpop.trf.xlu0 }
 0x159   : > { %v697_v15 = vunpack.i.h.bf16 %v693_v11  ;;  %v694_v16 = vunpack.i.l.bf16 %v693_v11 }
 0x15b   : > { %v457_v17 = vpack.c.bf16 %v697_v15, %v697_v15  ;;  %v441_v19 = vpack.c.bf16 %v694_v16, %v694_v16 }
 0x15d   : > { %490 = vst.msk [vmem:[%s846_s17 + $0x7c] sm:$0xf] %vm458_vm8, %v457_v17 }
 0x15e   : > { %474 = vst.msk [vmem:[%s846_s17 + $0x3c] sm:$0xf] %vm458_vm8, %v441_v19 }
 0x15f PF: > { %s11_s8 = sadd.s32 1, %s722_s8   ;;  %s923_s6 = smov %s718_s7 }
 0x160   : > { %p8_p5 = scmp.ge.s32.totalorder %s11_s8, 4   ;;  %s924_s7 = smov %s926_s9 }
 0x162   :  { %10 = sbr.rel (!%p8_p5) target bundleno = 2 (0x2), region = 54 }

// kernel: roi_action_head_forward.3
= control target key start
LH: loop header
LB: loop body
LE: loop exit
PB: predicated region body
PF: predicated region fallthrough
CT: control target
= control target key end

     0   :  { %s763_s6 = smov 0   ;;  %s765_s7 = smov 0   ;;  %s915_s0 = inlined_call_operand.vmem [shape: f32[2,8,4,256], index: 0, kind: input, shape index: {}]   ;;  %s916_s1 = inlined_call_operand.vmem [shape: bf16[2,256,8], index: 1, kind: output, shape index: {}]  }
   0x1   :  { %s767_s8 = smov 0  }
   0x2 LB: > { %s23_s9 = sadd.s32 1, %s746_s7  ;;  %p609_p0 = scmp.ge.s32.totalorder %s750_s8, 1  ;;  %s750_s8 = sphi %s767_s8, %s11_s8   ;;  %s746_s7 = sphi %s765_s7, %s918_s7   ;;  %s742_s6 = sphi %s763_s6, %s917_s6  }
   0x3   : > { %p25_p1 = scmp.ge.s32.totalorder %s23_s9, 2  ;;  %p109_p2 = scmp.lt.s32.totalorder %s750_s8, 3 }
   0x5   : > { %s920_s9 = smov (%p25_p1, %s23_s9), 0  ;;  %p110_p3 = pnand %p609_p0, %p109_p2 }
   0x6   : > { %p138_p4 = scmp.lt.s32.totalorder (!%p110_p3), %s742_s6, 1 }
   0x7   : > { %113 = sbr.rel (%p110_p3) target bundleno = 359 (0x167), region = 24 }
   0xc   : > { %v752_v0 = vmov 4.0   ;;  %s922_s6 = smov (!%p138_p4, %s742_s6), 1  ;;  %vm215_vm0 = vcmask 1043456   ;;  %vm367_vm2 = vcmask 1041409   ;;  %vm369_vm3 = vcmask 1042434  }
   0xd   : > { %726 = vrcp.f32 %v752_v0  ;;  %s616_s10 = sshll.u32 %s922_s6, 6  ;;  %vm371_vm4 = vcmask 1043459   ;;  %vm373_vm5 = vcmask 1044484   ;;  %vm375_vm6 = vcmask 1045509   ;;  %s617_s14 = sshll.u32 %s922_s6, 7 }
   0xe   : > { %s146_s13 = scalar_lea.vmem %s915_s0, %s616_s10  ;;  %vm377_vm7 = vcmask 1046534   ;;  %vm379_vm8 = vcmask 1047559   ;;  %s840_s17 = scalar_lea.vmem %s916_s1, %s617_s14  ;;  %vm486_vm9 = vcmask 60416  }
   0xf   : > { %v156_v1 = vld [vmem:[%s146_s13] sm:$0xff]  ;;  %v157_v2 = vld [vmem:[%s146_s13 + $0x8] sm:$0xff]  ;;  %v158_v3 = vld [vmem:[%s146_s13 + $0x10] sm:$0xff] }
  0x10   : > { %v159_v5 = vld [vmem:[%s146_s13 + $0x18] sm:$0xff]  ;;  %172 = vst [vmem:[#allocation1] ss:$2 sm:$0xff] %v156_v1  ;;  %v160_v7 = vld [vmem:[%s146_s13 + $0x20] sm:$0xff]  ;;  %v161_v9 = vld [vmem:[%s146_s13 + $0x28] sm:$0xff] }
  0x11   : > { %176 = vst [vmem:[#allocation1 + $0x10] ss:$2 sm:$0xff] %v157_v2  ;;  %v162_v12 = vld [vmem:[%s146_s13 + $0x30] sm:$0xff]  ;;  %v163_v15 = vld [vmem:[%s146_s13 + $0x38] sm:$0xff] }
  0x12   : > { %180 = vst [vmem:[#allocation1 + $0x20] ss:$2 sm:$0xff] %v158_v3 }
  0x13   : > { %v787_v4 = vpop.eup %726  ;;  %184 = vst [vmem:[#allocation1 + $0x30] ss:$2 sm:$0xff] %v159_v5 }
  0x14   : > { %v329_v6 = vmul.f32 4.0, %v787_v4  ;;  %vm333_vm1 = vweird.f32 %v787_v4 }
  0x16   : > { %v330_v8 = vsub.f32 1.0, %v329_v6 }
  0x17   : > { %v173_v10 = vld.sshfl [vmem:[#allocation1] sm:$0xff pattern:$0x75316420]  ;;  %v174_v11 = vld.sshfl [vmem:[#allocation1 + $0x8] sm:$0xff pattern:$0x75316420] }
  0x18   : > { %v177_v13 = vld.sshfl [vmem:[#allocation1 + $0x10] sm:$0xff pattern:$0x75316420]  ;;  %v178_v14 = vld.sshfl [vmem:[#allocation1 + $0x18] sm:$0xff pattern:$0x75316420]  ;;  %v331_v38 = vmul.f32 %v787_v4, %v330_v8 }
  0x19   : > { %v181_v16 = vld.sshfl [vmem:[#allocation1 + $0x20] sm:$0xff pattern:$0x75316420]  ;;  %v182_v17 = vld.sshfl [vmem:[#allocation1 + $0x28] sm:$0xff pattern:$0x75316420] }
  0x1a   : > { %v185_v18 = vld.sshfl [vmem:[#allocation1 + $0x30] sm:$0xff pattern:$0x75316420]  ;;  %v186_v19 = vld.sshfl [vmem:[#allocation1 + $0x38] sm:$0xff pattern:$0x75316420]  ;;  %v332_v51 = vadd.f32 %v787_v4, %v331_v38 }
  0x1b   : > { %187 = vst [vmem:[#allocation1] ss:$2 sm:$0xff] %v160_v7  ;;  %v216_v20 = vsel %vm215_vm0, %v173_v10, 0.0  ;;  %v223_v21 = vsel %vm215_vm0, %v174_v11, 0.0  ;;  %v230_v22 = vsel %vm215_vm0, %v177_v13, 0.0  ;;  %v237_v23 = vsel %vm215_vm0, %v178_v14, 0.0 }
  0x1c   : > { %190 = vst [vmem:[#allocation1 + $0x10] ss:$2 sm:$0xff] %v161_v9  ;;  %v217_v24 = vrot.slane %v216_v20, 4  ;;  %v224_v25 = vrot.slane %v223_v21, 4  ;;  %v231_v26 = vrot.slane %v230_v22, 4  ;;  %v238_v27 = vrot.slane %v237_v23, 4 }
  0x1d   : > { %193 = vst [vmem:[#allocation1 + $0x20] ss:$2 sm:$0xff] %v162_v12  ;;  %v244_v28 = vsel %vm215_vm0, %v181_v16, 0.0  ;;  %v251_v29 = vsel %vm215_vm0, %v182_v17, 0.0  ;;  %v258_v30 = vsel %vm215_vm0, %v185_v18, 0.0  ;;  %v265_v31 = vsel %vm215_vm0, %v186_v19, 0.0 }
  0x1e   : > { %196 = vst [vmem:[#allocation1 + $0x30] ss:$2 sm:$0xff] %v163_v15  ;;  %v218_v32 = vadd.f32 %v217_v24, %v216_v20  ;;  %v225_v33 = vadd.f32 %v224_v25, %v223_v21  ;;  %v232_v34 = vadd.f32 %v231_v26, %v230_v22  ;;  %v239_v35 = vadd.f32 %v238_v27, %v237_v23 }
  0x1f   : > { %v245_v36 = vrot.slane %v244_v28, 4  ;;  %v252_v37 = vrot.slane %v251_v29, 4  ;;  %v259_v43 = vrot.slane %v258_v30, 4  ;;  %v266_v44 = vrot.slane %v265_v31, 4 }
  0x20   : > { %v219_v39 = vrot.slane %v218_v32, 2  ;;  %v226_v40 = vrot.slane %v225_v33, 2  ;;  %v233_v41 = vrot.slane %v232_v34, 2  ;;  %v240_v42 = vrot.slane %v239_v35, 2 }
  0x21   : > { %v246_v49 = vadd.f32 %v245_v36, %v244_v28  ;;  %v253_v50 = vadd.f32 %v252_v37, %v251_v29  ;;  %v260_v55 = vadd.f32 %v259_v43, %v258_v30  ;;  %v267_v56 = vadd.f32 %v266_v44, %v265_v31 }
  0x22   : > { %v220_v45 = vadd.f32 %v219_v39, %v218_v32  ;;  %v227_v46 = vadd.f32 %v226_v40, %v225_v33  ;;  %v234_v47 = vadd.f32 %v233_v41, %v232_v34  ;;  %v241_v48 = vadd.f32 %v240_v42, %v239_v35  ;;  %v188_v52 = vld.sshfl [vmem:[#allocation1] sm:$0xff pattern:$0x75316420]  ;;  %v189_v53 = vld.sshfl [vmem:[#allocation1 + $0x8] sm:$0xff pattern:$0x75316420] }
  0x23   : > { %v191_v54 = vld.sshfl [vmem:[#allocation1 + $0x10] sm:$0xff pattern:$0x75316420]  ;;  %v192_v57 = vld.sshfl [vmem:[#allocation1 + $0x18] sm:$0xff pattern:$0x75316420]  ;;  %v802_v0 = vsel %vm333_vm1, %v787_v4, %v332_v51 }
  0x24   : > { %v221_v58 = vrot.slane %v220_v45, 1  ;;  %v228_v59 = vrot.slane %v227_v46, 1  ;;  %v235_v60 = vrot.slane %v234_v47, 1  ;;  %v242_v61 = vrot.slane %v241_v48, 1 }
  0x25   : > { %v247_v62 = vrot.slane %v246_v49, 2  ;;  %v254_v63 = vrot.slane %v253_v50, 2  ;;  %v261_v3 = vrot.slane %v260_v55, 2  ;;  %v268_v5 = vrot.slane %v267_v56, 2 }
  0x26   : > { %v194_v6 = vld.sshfl [vmem:[#allocation1 + $0x20] sm:$0xff pattern:$0x75316420]  ;;  %v195_v7 = vld.sshfl [vmem:[#allocation1 + $0x28] sm:$0xff pattern:$0x75316420]  ;;  %v222_v14 = vadd.f32 %v221_v58, %v220_v45  ;;  %v229_v15 = vadd.f32 %v228_v59, %v227_v46  ;;  %v808_v4 = vadd.f32 %v235_v60, %v234_v47  ;;  %v810_v16 = vadd.f32 %v242_v61, %v241_v48 }
  0x27   : > { %v248_v1 = vadd.f32 %v247_v62, %v246_v49  ;;  %v255_v2 = vadd.f32 %v254_v63, %v253_v50  ;;  %v272_v8 = vsel %vm215_vm0, %v188_v52, 0.0  ;;  %v279_v9 = vsel %vm215_vm0, %v189_v53, 0.0  ;;  %v197_v12 = vld.sshfl [vmem:[#allocation1 + $0x30] sm:$0xff pattern:$0x75316420] }
  0x28   : > { %v286_v10 = vsel %vm215_vm0, %v191_v54, 0.0  ;;  %v293_v11 = vsel %vm215_vm0, %v192_v57, 0.0  ;;  %v198_v13 = vld.sshfl [vmem:[#allocation1 + $0x38] sm:$0xff pattern:$0x75316420]  ;;  %v273_v17 = vrot.slane %v272_v8, 4  ;;  %v262_v23 = vadd.f32 %v261_v3, %v260_v55 }
  0x29   : > { %v280_v18 = vrot.slane %v279_v9, 4  ;;  %v287_v19 = vrot.slane %v286_v10, 4  ;;  %v294_v20 = vrot.slane %v293_v11, 4  ;;  %v249_v21 = vrot.slane %v248_v1, 1 }
  0x2a   : > { %v256_v22 = vrot.slane %v255_v2, 1  ;;  %v269_v24 = vadd.f32 %v268_v5, %v267_v56  ;;  %v274_v25 = vadd.f32 %v273_v17, %v272_v8  ;;  %v300_v29 = vsel %vm215_vm0, %v194_v6, 0.0 }
  0x2b   : > { %v281_v26 = vadd.f32 %v280_v18, %v279_v9  ;;  %v288_v27 = vadd.f32 %v287_v19, %v286_v10  ;;  %v295_v28 = vadd.f32 %v294_v20, %v293_v11  ;;  %v307_v30 = vsel %vm215_vm0, %v195_v7, 0.0 }
  0x2c   : > { %v314_v31 = vsel %vm215_vm0, %v197_v12, 0.0  ;;  %v321_v32 = vsel %vm215_vm0, %v198_v13, 0.0  ;;  %v275_v33 = vrot.slane %v274_v25, 2  ;;  %v301_v37 = vrot.slane %v300_v29, 4 }
  0x2d   : > { %v282_v34 = vrot.slane %v281_v26, 2  ;;  %v289_v35 = vrot.slane %v288_v27, 2  ;;  %v296_v36 = vrot.slane %v295_v28, 2  ;;  %v308_v38 = vrot.slane %v307_v30, 4 }
  0x2e   : > { %v315_v39 = vrot.slane %v314_v31, 4  ;;  %v322_v40 = vrot.slane %v321_v32, 4  ;;  %v276_v41 = vadd.f32 %v275_v33, %v274_v25  ;;  %v302_v45 = vadd.f32 %v301_v37, %v300_v29 }
  0x2f   : > { %v283_v42 = vadd.f32 %v282_v34, %v281_v26  ;;  %v290_v43 = vadd.f32 %v289_v35, %v288_v27  ;;  %v297_v44 = vadd.f32 %v296_v36, %v295_v28  ;;  %v309_v46 = vadd.f32 %v308_v38, %v307_v30 }
  0x30   : > { %v316_v47 = vadd.f32 %v315_v39, %v314_v31  ;;  %v323_v48 = vadd.f32 %v322_v40, %v321_v32  ;;  %v263_v49 = vrot.slane %v262_v23, 1  ;;  %v270_v50 = vrot.slane %v269_v24, 1 }
  0x31   : > { %v277_v51 = vrot.slane %v276_v41, 1  ;;  %v284_v52 = vrot.slane %v283_v42, 1  ;;  %v303_v53 = vrot.slane %v302_v45, 2  ;;  %v310_v54 = vrot.slane %v309_v46, 2 }
  0x32   : > { %v317_v55 = vrot.slane %v316_v47, 2  ;;  %v324_v56 = vrot.slane %v323_v48, 2  ;;  %v250_v57 = vadd.f32 %v249_v21, %v248_v1  ;;  %v257_v58 = vadd.f32 %v256_v22, %v255_v2 }
  0x33   : > { %v291_v59 = vrot.slane %v290_v43, 1  ;;  %v298_v60 = vrot.slane %v297_v44, 1  ;;  %v304_v61 = vadd.f32 %v303_v53, %v302_v45  ;;  %v311_v62 = vadd.f32 %v310_v54, %v309_v46 }
  0x34   : > { %v318_v63 = vadd.f32 %v317_v55, %v316_v47  ;;  %v325_v3 = vadd.f32 %v324_v56, %v323_v48  ;;  %v264_v5 = vadd.f32 %v263_v49, %v262_v23  ;;  %v271_v6 = vadd.f32 %v270_v50, %v269_v24 }
  0x35   : > { %v278_v7 = vadd.f32 %v277_v51, %v276_v41  ;;  %v285_v8 = vadd.f32 %v284_v52, %v283_v42  ;;  %v305_v9 = vrot.slane %v304_v61, 1  ;;  %v312_v10 = vrot.slane %v311_v62, 1 }
  0x36   : > { %v319_v11 = vrot.slane %v318_v63, 1  ;;  %v326_v12 = vrot.slane %v325_v3, 1  ;;  %v292_v13 = vadd.f32 %v291_v59, %v290_v43  ;;  %v299_v17 = vadd.f32 %v298_v60, %v297_v44 }
  0x37   : > { %v335_v18 = vmul.f32 %v802_v0, %v222_v14  ;;  %v336_v1 = vmul.f32 %v802_v0, %v229_v15  ;;  %v306_v2 = vadd.f32 %v305_v9, %v304_v61  ;;  %v337_v19 = vmul.f32 %v802_v0, %v808_v4 }
  0x38   : > { %v338_v20 = vmul.f32 %v802_v0, %v810_v16  ;;  %v339_v21 = vmul.f32 %v802_v0, %v250_v57  ;;  %v313_v22 = vadd.f32 %v312_v10, %v311_v62  ;;  %v340_v23 = vmul.f32 %v802_v0, %v257_v58 }
  0x39   : > { %v341_v24 = vmul.f32 %v802_v0, %v264_v5  ;;  %v342_v25 = vmul.f32 %v802_v0, %v271_v6  ;;  %v320_v26 = vadd.f32 %v319_v11, %v318_v63  ;;  %v327_v14 = vadd.f32 %v326_v12, %v325_v3 }
  0x3a   : > { %v343_v15 = vmul.f32 %v802_v0, %v278_v7  ;;  %v344_v27 = vmul.f32 %v802_v0, %v285_v8  ;;  %v345_v4 = vmul.f32 %v802_v0, %v292_v13  ;;  %v346_v16 = vmul.f32 %v802_v0, %v299_v17 }
  0x3b   : > { %v347_v28 = vmul.f32 %v802_v0, %v306_v2  ;;  %v368_v29 = vsel %vm367_vm2, %v337_v19, %v335_v18  ;;  %v348_v30 = vmul.f32 %v802_v0, %v313_v22  ;;  %v381_v32 = vsel %vm367_vm2, %v338_v20, %v336_v1 }
  0x3c   : > { %v370_v31 = vsel %vm369_vm3, %v339_v21, %v368_v29  ;;  %v349_v33 = vmul.f32 %v802_v0, %v320_v26  ;;  %v382_v35 = vsel %vm369_vm3, %v340_v23, %v381_v32  ;;  %v350_v36 = vmul.f32 %v802_v0, %v327_v14 }
  0x3d   : > { %v372_v34 = vsel %vm371_vm4, %v341_v24, %v370_v31  ;;  %v383_v38 = vsel %vm371_vm4, %v342_v25, %v382_v35 }
  0x3e   : > { %v374_v37 = vsel %vm373_vm5, %v343_v15, %v372_v34  ;;  %v384_v40 = vsel %vm373_vm5, %v344_v27, %v383_v38 }
  0x3f   : > { %v376_v39 = vsel %vm375_vm6, %v345_v4, %v374_v37  ;;  %v385_v42 = vsel %vm375_vm6, %v346_v16, %v384_v40 }
  0x40   : > { %v378_v41 = vsel %vm377_vm7, %v347_v28, %v376_v39  ;;  %v386_v44 = vsel %vm377_vm7, %v348_v30, %v385_v42 }
  0x41   : > { %v380_v43 = vsel %vm379_vm8, %v349_v33, %v378_v41  ;;  %v387_v45 = vsel %vm379_vm8, %v350_v36, %v386_v44 }
  0x42   : > { %v644_v46 = vpack.i.bf16 %v387_v45, %v380_v43 }
  0x44   : > { %645 = vxpose.xlu0.b32.start.end [1/1] (short) %v644_v46, 128 }
  0xe8   : > { %v646_v47 = vpop.trf.xlu0 }
  0xe9   : > { %v650_v48 = vunpack.i.h.bf16 %v646_v47  ;;  %v647_v49 = vunpack.i.l.bf16 %v646_v47 }
  0xeb   : > { %v470_v0 = vpack.c.bf16 %v650_v48, %v650_v48  ;;  %v454_v50 = vpack.c.bf16 %v647_v49, %v647_v49 }
  0xed   : > { %503 = vst.msk [vmem:[%s840_s17 + $0x40] sm:$0xf] %vm486_vm9, %v470_v0 }
  0xee   : > { %487 = vst.msk [vmem:[%s840_s17] sm:$0xf] %vm486_vm9, %v454_v50 }
  0xf0   : > { %v651_v51 = vpop.trf.xlu0 }
  0xf1   : > { %v655_v52 = vunpack.i.h.bf16 %v651_v51  ;;  %v652_v53 = vunpack.i.l.bf16 %v651_v51 }
  0xf3   : > { %v471_v54 = vpack.c.bf16 %v655_v52, %v655_v52  ;;  %v455_v55 = vpack.c.bf16 %v652_v53, %v652_v53 }
  0xf5   : > { %504 = vst.msk [vmem:[%s840_s17 + $0x44] sm:$0xf] %vm486_vm9, %v471_v54 }
  0xf6   : > { %488 = vst.msk [vmem:[%s840_s17 + $0x4] sm:$0xf] %vm486_vm9, %v455_v55 }
  0xf8   : > { %v656_v56 = vpop.trf.xlu0 }
  0xf9   : > { %v660_v57 = vunpack.i.h.bf16 %v656_v56  ;;  %v657_v58 = vunpack.i.l.bf16 %v656_v56 }
  0xfb   : > { %v472_v59 = vpack.c.bf16 %v660_v57, %v660_v57  ;;  %v456_v60 = vpack.c.bf16 %v657_v58, %v657_v58 }
  0xfd   : > { %505 = vst.msk [vmem:[%s840_s17 + $0x48] sm:$0xf] %vm486_vm9, %v472_v59 }
  0xfe   : > { %489 = vst.msk [vmem:[%s840_s17 + $0x8] sm:$0xf] %vm486_vm9, %v456_v60 }
 0x100   : > { %v661_v61 = vpop.trf.xlu0 }
 0x101   : > { %v665_v62 = vunpack.i.h.bf16 %v661_v61  ;;  %v662_v63 = vunpack.i.l.bf16 %v661_v61 }
 0x103   : > { %v473_v3 = vpack.c.bf16 %v665_v62, %v665_v62  ;;  %v457_v5 = vpack.c.bf16 %v662_v63, %v662_v63 }
 0x105   : > { %506 = vst.msk [vmem:[%s840_s17 + $0x4c] sm:$0xf] %vm486_vm9, %v473_v3 }
 0x106   : > { %490 = vst.msk [vmem:[%s840_s17 + $0xc] sm:$0xf] %vm486_vm9, %v457_v5 }
 0x108   : > { %v666_v6 = vpop.trf.xlu0 }
 0x109   : > { %v670_v7 = vunpack.i.h.bf16 %v666_v6  ;;  %v667_v8 = vunpack.i.l.bf16 %v666_v6 }
 0x10b   : > { %v474_v9 = vpack.c.bf16 %v670_v7, %v670_v7  ;;  %v458_v10 = vpack.c.bf16 %v667_v8, %v667_v8 }
 0x10d   : > { %507 = vst.msk [vmem:[%s840_s17 + $0x50] sm:$0xf] %vm486_vm9, %v474_v9 }
 0x10e   : > { %491 = vst.msk [vmem:[%s840_s17 + $0x10] sm:$0xf] %vm486_vm9, %v458_v10 }
 0x110   : > { %v671_v11 = vpop.trf.xlu0 }
 0x111   : > { %v675_v12 = vunpack.i.h.bf16 %v671_v11  ;;  %v672_v13 = vunpack.i.l.bf16 %v671_v11 }
 0x113   : > { %v475_v17 = vpack.c.bf16 %v675_v12, %v675_v12  ;;  %v459_v18 = vpack.c.bf16 %v672_v13, %v672_v13 }
 0x115   : > { %508 = vst.msk [vmem:[%s840_s17 + $0x54] sm:$0xf] %vm486_vm9, %v475_v17 }
 0x116   : > { %492 = vst.msk [vmem:[%s840_s17 + $0x14] sm:$0xf] %vm486_vm9, %v459_v18 }
 0x118   : > { %v676_v1 = vpop.trf.xlu0 }
 0x119   : > { %v680_v2 = vunpack.i.h.bf16 %v676_v1  ;;  %v677_v19 = vunpack.i.l.bf16 %v676_v1 }
 0x11b   : > { %v476_v20 = vpack.c.bf16 %v680_v2, %v680_v2  ;;  %v460_v21 = vpack.c.bf16 %v677_v19, %v677_v19 }
 0x11d   : > { %509 = vst.msk [vmem:[%s840_s17 + $0x58] sm:$0xf] %vm486_vm9, %v476_v20 }
 0x11e   : > { %493 = vst.msk [vmem:[%s840_s17 + $0x18] sm:$0xf] %vm486_vm9, %v460_v21 }
 0x120   : > { %v681_v22 = vpop.trf.xlu0 }
 0x121   : > { %v685_v23 = vunpack.i.h.bf16 %v681_v22  ;;  %v682_v24 = vunpack.i.l.bf16 %v681_v22 }
 0x123   : > { %v477_v25 = vpack.c.bf16 %v685_v23, %v685_v23  ;;  %v461_v26 = vpack.c.bf16 %v682_v24, %v682_v24 }
 0x125   : > { %510 = vst.msk [vmem:[%s840_s17 + $0x5c] sm:$0xf] %vm486_vm9, %v477_v25 }
 0x126   : > { %494 = vst.msk [vmem:[%s840_s17 + $0x1c] sm:$0xf] %vm486_vm9, %v461_v26 }
 0x128   : > { %v686_v14 = vpop.trf.xlu0 }
 0x129   : > { %v690_v15 = vunpack.i.h.bf16 %v686_v14  ;;  %v687_v27 = vunpack.i.l.bf16 %v686_v14 }
 0x12b   : > { %v478_v4 = vpack.c.bf16 %v690_v15, %v690_v15  ;;  %v462_v16 = vpack.c.bf16 %v687_v27, %v687_v27 }
 0x12d   : > { %511 = vst.msk [vmem:[%s840_s17 + $0x60] sm:$0xf] %vm486_vm9, %v478_v4 }
 0x12e   : > { %495 = vst.msk [vmem:[%s840_s17 + $0x20] sm:$0xf] %vm486_vm9, %v462_v16 }
 0x130   : > { %v691_v28 = vpop.trf.xlu0 }
 0x131   : > { %v695_v29 = vunpack.i.h.bf16 %v691_v28  ;;  %v692_v30 = vunpack.i.l.bf16 %v691_v28 }
 0x133   : > { %v479_v31 = vpack.c.bf16 %v695_v29, %v695_v29  ;;  %v463_v32 = vpack.c.bf16 %v692_v30, %v692_v30 }
 0x135   : > { %512 = vst.msk [vmem:[%s840_s17 + $0x64] sm:$0xf] %vm486_vm9, %v479_v31 }
 0x136   : > { %496 = vst.msk [vmem:[%s840_s17 + $0x24] sm:$0xf] %vm486_vm9, %v463_v32 }
 0x138   : > { %v696_v33 = vpop.trf.xlu0 }
 0x139   : > { %v700_v34 = vunpack.i.h.bf16 %v696_v33  ;;  %v697_v35 = vunpack.i.l.bf16 %v696_v33 }
 0x13b   : > { %v480_v36 = vpack.c.bf16 %v700_v34, %v700_v34  ;;  %v464_v37 = vpack.c.bf16 %v697_v35, %v697_v35 }
 0x13d   : > { %513 = vst.msk [vmem:[%s840_s17 + $0x68] sm:$0xf] %vm486_vm9, %v480_v36 }
 0x13e   : > { %497 = vst.msk [vmem:[%s840_s17 + $0x28] sm:$0xf] %vm486_vm9, %v464_v37 }
 0x140   : > { %v701_v38 = vpop.trf.xlu0 }
 0x141   : > { %v705_v39 = vunpack.i.h.bf16 %v701_v38  ;;  %v702_v40 = vunpack.i.l.bf16 %v701_v38 }
 0x143   : > { %v481_v41 = vpack.c.bf16 %v705_v39, %v705_v39  ;;  %v465_v42 = vpack.c.bf16 %v702_v40, %v702_v40 }
 0x145   : > { %514 = vst.msk [vmem:[%s840_s17 + $0x6c] sm:$0xf] %vm486_vm9, %v481_v41 }
 0x146   : > { %498 = vst.msk [vmem:[%s840_s17 + $0x2c] sm:$0xf] %vm486_vm9, %v465_v42 }
 0x148   : > { %v706_v43 = vpop.trf.xlu0 }
 0x149   : > { %v710_v44 = vunpack.i.h.bf16 %v706_v43  ;;  %v707_v45 = vunpack.i.l.bf16 %v706_v43 }
 0x14b   : > { %v482_v46 = vpack.c.bf16 %v710_v44, %v710_v44  ;;  %v466_v47 = vpack.c.bf16 %v707_v45, %v707_v45 }
 0x14d   : > { %515 = vst.msk [vmem:[%s840_s17 + $0x70] sm:$0xf] %vm486_vm9, %v482_v46 }
 0x14e   : > { %499 = vst.msk [vmem:[%s840_s17 + $0x30] sm:$0xf] %vm486_vm9, %v466_v47 }
 0x150   : > { %v711_v48 = vpop.trf.xlu0 }
 0x151   : > { %v715_v49 = vunpack.i.h.bf16 %v711_v48  ;;  %v712_v0 = vunpack.i.l.bf16 %v711_v48 }
 0x153   : > { %v483_v50 = vpack.c.bf16 %v715_v49, %v715_v49  ;;  %v467_v51 = vpack.c.bf16 %v712_v0, %v712_v0 }
 0x155   : > { %516 = vst.msk [vmem:[%s840_s17 + $0x74] sm:$0xf] %vm486_vm9, %v483_v50 }
 0x156   : > { %500 = vst.msk [vmem:[%s840_s17 + $0x34] sm:$0xf] %vm486_vm9, %v467_v51 }
 0x158   : > { %v716_v52 = vpop.trf.xlu0 }
 0x159   : > { %v720_v53 = vunpack.i.h.bf16 %v716_v52  ;;  %v717_v54 = vunpack.i.l.bf16 %v716_v52 }
 0x15b   : > { %v484_v55 = vpack.c.bf16 %v720_v53, %v720_v53  ;;  %v468_v56 = vpack.c.bf16 %v717_v54, %v717_v54 }
 0x15d   : > { %517 = vst.msk [vmem:[%s840_s17 + $0x78] sm:$0xf] %vm486_vm9, %v484_v55 }
 0x15e   : > { %501 = vst.msk [vmem:[%s840_s17 + $0x38] sm:$0xf] %vm486_vm9, %v468_v56 }
 0x160   : > { %v721_v57 = vpop.trf.xlu0 }
 0x161   : > { %v725_v58 = vunpack.i.h.bf16 %v721_v57  ;;  %v722_v59 = vunpack.i.l.bf16 %v721_v57 }
 0x163   : > { %v485_v60 = vpack.c.bf16 %v725_v58, %v725_v58  ;;  %v469_v61 = vpack.c.bf16 %v722_v59, %v722_v59 }
 0x165   : > { %518 = vst.msk [vmem:[%s840_s17 + $0x7c] sm:$0xf] %vm486_vm9, %v485_v60 }
 0x166   : > { %502 = vst.msk [vmem:[%s840_s17 + $0x3c] sm:$0xf] %vm486_vm9, %v469_v61 }
 0x167 PF: > { %s11_s8 = sadd.s32 1, %s750_s8   ;;  %s917_s6 = smov %s746_s7 }
 0x168   : > { %p8_p5 = scmp.ge.s32.totalorder %s11_s8, 4   ;;  %s918_s7 = smov %s920_s9 }
 0x16a   :  { %10 = sbr.rel (!%p8_p5) target bundleno = 2 (0x2), region = 57 }

// kernel: roi_action_head_forward.5
= control target key start
LH: loop header
LB: loop body
LE: loop exit
PB: predicated region body
PF: predicated region fallthrough
CT: control target
= control target key end

     0   :  { %s1705_s30 = smov 0   ;;  %s1707_s10 = smov 0   ;;  %s1909_s0 = inlined_call_operand.vmem [shape: bf16[2,1,256,256], index: 0, kind: input, shape index: {}]   ;;  %s1910_s1 = inlined_call_operand.vmem [shape: bf16[2,256,16], index: 1, kind: input, shape index: {}]   ;;  %s1911_s2 = inlined_call_operand.vmem [shape: bf16[16,32], index: 2, kind: input, shape index: {}]   ;;  %s1912_s3 = inlined_call_operand.vmem [shape: f32[1,32], index: 3, kind: input, shape index: {}]   ;;  %s1913_s4 = inlined_call_operand.vmem [shape: bf16[32,32], index: 4, kind: input, shape index: {}]   ;;  %s1914_s5 = inlined_call_operand.vmem [shape: f32[1,32], index: 5, kind: input, shape index: {}]   ;;  %s1915_s6 = inlined_call_operand.vmem [shape: bf16[32,16], index: 6, kind: input, shape index: {}]   ;;  %s1916_s7 = inlined_call_operand.vmem [shape: f32[1,16], index: 7, kind: input, shape index: {}]   ;;  %s1917_s8 = inlined_call_operand.vmem [shape: f32[2,1,16,16], index: 8, kind: output, shape index: {0}]   ;;  %s1918_s9 = inlined_call_operand.vmem [shape: f32[2,1,16,16], index: 9, kind: output, shape index: {1}]  }
   0x1   :  { %s1709_s11 = smov 0  }
   0x2 LB: > { %s32_s12 = sadd.s32 1, %s1649_s10  ;;  %p1287_p0 = scmp.ge.s32.totalorder %s1653_s11, 1  ;;  %s1653_s11 = sphi %s1709_s11, %s20_s11   ;;  %s1649_s10 = sphi %s1707_s10, %s1920_s10   ;;  %s1645_s30 = sphi %s1705_s30, %s1919_s30  }
   0x3   : > { %p34_p1 = scmp.ge.s32.totalorder %s32_s12, 2  ;;  %p322_p2 = scmp.lt.s32.totalorder %s1653_s11, 3 }
   0x5   : > { %s1922_s12 = smov (%p34_p1, %s32_s12), 0  ;;  %p323_p3 = pnand %p1287_p0, %p322_p2 }
   0x6   : > { %p380_p4 = scmp.lt.s32.totalorder (!%p323_p3), %s1645_s30, 1 }
   0x7   : > { %326 = sbr.rel (%p323_p3) target bundleno = 1022 (0x3fe), region = 52 }
   0xc   : > { %s1924_s30 = smov (!%p380_p4, %s1645_s30), 1  ;;  %vm941_vm0 = vcmask 130048   ;;  %vm997_vm1 = vcmask 261120  }
   0xd   : > { %s1516_s13 = sshll.u32 %s1924_s30, 7  ;;  %s1515_s17 = sshll.u32 %s1924_s30, 8 }
   0xe   : > { %s1729_s16 = scalar_lea.vmem %s1910_s1, %s1516_s13  ;;  %s1747_s20 = scalar_lea.vmem %s1909_s0, %s1515_s17 }
   0xf   : > { %v1558_v0 = vld [vmem:[%s1729_s16 + $0x38] sm:$0xff]  ;;  %v1557_v2 = vld [vmem:[%s1729_s16 + $0x30] sm:$0xff]  ;;  %v1556_v4 = vld [vmem:[%s1729_s16 + $0x28] sm:$0xff]  ;;  %s1517_s27 = sshll.u32 %s1924_s30, 4 }
  0x10   : > { %v1566_v1 = vld [vmem:[%s1729_s16 + $0x78] sm:$0xff]  ;;  %733 = vmatpush.bf16.msra.mxu0 %v1558_v0  ;;  %v1565_v3 = vld [vmem:[%s1729_s16 + $0x70] sm:$0xff]  ;;  %1572 = vmatpush.bf16.msra.mxu3 %v1558_v0  ;;  %v1564_v5 = vld [vmem:[%s1729_s16 + $0x68] sm:$0xff]  ;;  %s402_s13 = scalar_lea.vmem %s1917_s8, %s1517_s27  ;;  %s411_s26 = scalar_lea.vmem %s1918_s9, %s1517_s27 }
  0x11   : > { %822 = vmatpush.bf16.msra.mxu1 %v1566_v1  ;;  %1580 = vmatpush.bf16.msra.mxu2 %v1566_v1  ;;  %v1555_v6 = vld [vmem:[%s1729_s16 + $0x20] sm:$0xff]  ;;  %v1554_v8 = vld [vmem:[%s1729_s16 + $0x18] sm:$0xff]  ;;  %v1553_v10 = vld [vmem:[%s1729_s16 + $0x10] sm:$0xff] }
  0x12   : > { %v1563_v7 = vld [vmem:[%s1729_s16 + $0x60] sm:$0xff]  ;;  %v1562_v9 = vld [vmem:[%s1729_s16 + $0x58] sm:$0xff]  ;;  %v1561_v11 = vld [vmem:[%s1729_s16 + $0x50] sm:$0xff] }
  0x13   : > { %v1552_v12 = vld [vmem:[%s1729_s16 + $0x8] sm:$0xff]  ;;  %v1551_v14 = vld [vmem:[%s1729_s16] sm:$0xff]  ;;  %v1370_v22 = vld [vmem:[%s1747_s20 + $0x90] sm:$0xf] }
  0x14   : > { %734 = vmatpush.bf16.msra.mxu0 %v1557_v2  ;;  %1573 = vmatpush.bf16.msra.mxu3 %v1557_v2  ;;  %v1560_v13 = vld [vmem:[%s1729_s16 + $0x48] sm:$0xff]  ;;  %v1559_v15 = vld [vmem:[%s1729_s16 + $0x40] sm:$0xff]  ;;  %v1538_v23 = vld [vmem:[%s1747_s20 + $0x94] sm:$0xf0] }
  0x15   : > { %823 = vmatpush.bf16.msra.mxu1 %v1565_v3  ;;  %1581 = vmatpush.bf16.msra.mxu2 %v1565_v3  ;;  %v1298_v16 = vld [vmem:[%s1747_s20] sm:$0xf]  ;;  %v1520_v17 = vld [vmem:[%s1747_s20 + $0x4] sm:$0xf0]  ;;  %v1519_v18 = vld [vmem:[%s1747_s20 + $0x4] sm:$0xf]  ;;  %v1371_v24 = vor.u32 %v1538_v23, %v1370_v22 }
  0x16   : > { %v1300_v19 = vld [vmem:[%s1747_s20 + $0x8] sm:$0xf0]  ;;  %v1299_v20 = vor.u32 %v1520_v17, %v1298_v16  ;;  %v1537_v25 = vld [vmem:[%s1747_s20 + $0x94] sm:$0xf]  ;;  %v1372_v26 = vld [vmem:[%s1747_s20 + $0x98] sm:$0xf0] }
  0x17   : > { %v1303_v21 = vor.u32 %v1519_v18, %v1300_v19  ;;  %v1375_v27 = vor.u32 %v1537_v25, %v1372_v26  ;;  %v1306_v28 = vld [vmem:[%s1747_s20 + $0x10] sm:$0xf]  ;;  %v1522_v29 = vld [vmem:[%s1747_s20 + $0x14] sm:$0xf0]  ;;  %v1521_v30 = vld [vmem:[%s1747_s20 + $0x14] sm:$0xf] }
  0x18   : > { %735 = vmatpush.bf16.msra.mxu0 %v1556_v4  ;;  %1574 = vmatpush.bf16.msra.mxu3 %v1556_v4  ;;  %v1308_v31 = vld [vmem:[%s1747_s20 + $0x18] sm:$0xf0]  ;;  %v1307_v32 = vor.u32 %v1522_v29, %v1306_v28  ;;  %v1378_v34 = vld [vmem:[%s1747_s20 + $0xa0] sm:$0xf]  ;;  %v1540_v35 = vld [vmem:[%s1747_s20 + $0xa4] sm:$0xf0] }
  0x19   : > { %824 = vmatpush.bf16.msra.mxu1 %v1564_v5  ;;  %1582 = vmatpush.bf16.msra.mxu2 %v1564_v5  ;;  %v1311_v33 = vor.u32 %v1521_v30, %v1308_v31  ;;  %v1379_v36 = vor.u32 %v1540_v35, %v1378_v34  ;;  %v1539_v37 = vld [vmem:[%s1747_s20 + $0xa4] sm:$0xf]  ;;  %v1380_v38 = vld [vmem:[%s1747_s20 + $0xa8] sm:$0xf0]  ;;  %v1314_v40 = vld [vmem:[%s1747_s20 + $0x20] sm:$0xf] }
  0x1a   : > { %v1383_v39 = vor.u32 %v1539_v37, %v1380_v38  ;;  %v1524_v41 = vld [vmem:[%s1747_s20 + $0x24] sm:$0xf0]  ;;  %v1523_v42 = vld [vmem:[%s1747_s20 + $0x24] sm:$0xf]  ;;  %v1316_v43 = vld [vmem:[%s1747_s20 + $0x28] sm:$0xf0] }
  0x1b   : > { %v1315_v44 = vor.u32 %v1524_v41, %v1314_v40  ;;  %v1319_v45 = vor.u32 %v1523_v42, %v1316_v43  ;;  %v1386_v46 = vld [vmem:[%s1747_s20 + $0xb0] sm:$0xf]  ;;  %v1542_v47 = vld [vmem:[%s1747_s20 + $0xb4] sm:$0xf0]  ;;  %v1541_v49 = vld [vmem:[%s1747_s20 + $0xb4] sm:$0xf] }
  0x1c   : > { %736 = vmatpush.bf16.msra.mxu0 %v1555_v6  ;;  %1575 = vmatpush.bf16.msra.mxu3 %v1555_v6  ;;  %v1387_v48 = vor.u32 %v1542_v47, %v1386_v46  ;;  %v1388_v50 = vld [vmem:[%s1747_s20 + $0xb8] sm:$0xf0]  ;;  %v1322_v52 = vld [vmem:[%s1747_s20 + $0x30] sm:$0xf]  ;;  %v1526_v53 = vld [vmem:[%s1747_s20 + $0x34] sm:$0xf0] }
  0x1d   : > { %825 = vmatpush.bf16.msra.mxu1 %v1563_v7  ;;  %1583 = vmatpush.bf16.msra.mxu2 %v1563_v7  ;;  %v1391_v51 = vor.u32 %v1541_v49, %v1388_v50  ;;  %v1525_v54 = vld [vmem:[%s1747_s20 + $0x34] sm:$0xf]  ;;  %v1324_v55 = vld [vmem:[%s1747_s20 + $0x38] sm:$0xf0]  ;;  %v1323_v56 = vor.u32 %v1526_v53, %v1322_v52  ;;  %v1394_v58 = vld [vmem:[%s1747_s20 + $0xc0] sm:$0xf] }
  0x1e   : > { %v1327_v57 = vor.u32 %v1525_v54, %v1324_v55  ;;  %v1544_v59 = vld [vmem:[%s1747_s20 + $0xc4] sm:$0xf0]  ;;  %v1543_v61 = vld [vmem:[%s1747_s20 + $0xc4] sm:$0xf]  ;;  %v1396_v62 = vld [vmem:[%s1747_s20 + $0xc8] sm:$0xf0] }
  0x1f   : > { %v1395_v60 = vor.u32 %v1544_v59, %v1394_v58  ;;  %v1399_v63 = vor.u32 %v1543_v61, %v1396_v62  ;;  %v1330_v0 = vld [vmem:[%s1747_s20 + $0x40] sm:$0xf]  ;;  %v1528_v1 = vld [vmem:[%s1747_s20 + $0x44] sm:$0xf0]  ;;  %v1527_v2 = vld [vmem:[%s1747_s20 + $0x44] sm:$0xf] }
  0x20   : > { %737 = vmatpush.bf16.msra.mxu0 %v1554_v8  ;;  %1576 = vmatpush.bf16.msra.mxu3 %v1554_v8  ;;  %v1332_v3 = vld [vmem:[%s1747_s20 + $0x48] sm:$0xf0]  ;;  %v1331_v4 = vor.u32 %v1528_v1, %v1330_v0  ;;  %v1402_v6 = vld [vmem:[%s1747_s20 + $0xd0] sm:$0xf]  ;;  %v1546_v7 = vld [vmem:[%s1747_s20 + $0xd4] sm:$0xf0] }
  0x21   : > { %826 = vmatpush.bf16.msra.mxu1 %v1562_v9  ;;  %1584 = vmatpush.bf16.msra.mxu2 %v1562_v9  ;;  %v1335_v5 = vor.u32 %v1527_v2, %v1332_v3  ;;  %v1403_v8 = vor.u32 %v1546_v7, %v1402_v6  ;;  %v1545_v9 = vld [vmem:[%s1747_s20 + $0xd4] sm:$0xf]  ;;  %v1410_v18 = vld [vmem:[%s1747_s20 + $0xe0] sm:$0xf]  ;;  %v1548_v19 = vld [vmem:[%s1747_s20 + $0xe4] sm:$0xf0] }
  0x22   : > { %v1412_v22 = vld [vmem:[%s1747_s20 + $0xe8] sm:$0xf0]  ;;  %v1532_v25 = vld [vmem:[%s1747_s20 + $0x64] sm:$0xf0]  ;;  %v1531_v26 = vld [vmem:[%s1747_s20 + $0x64] sm:$0xf] }
  0x23   : > { %v1418_v30 = vld [vmem:[%s1747_s20 + $0xf0] sm:$0xf]  ;;  %v1550_v31 = vld [vmem:[%s1747_s20 + $0xf4] sm:$0xf0]  ;;  %v1420_v34 = vld [vmem:[%s1747_s20 + $0xf8] sm:$0xf0] }
  0x24   : > { %738 = vmatpush.bf16.msra.mxu0 %v1553_v10  ;;  %1577 = vmatpush.bf16.msra.mxu3 %v1553_v10  ;;  %v1404_v10 = vld [vmem:[%s1747_s20 + $0xd8] sm:$0xf0]  ;;  %v1534_v37 = vld [vmem:[%s1747_s20 + $0x74] sm:$0xf0]  ;;  %v1533_v38 = vld [vmem:[%s1747_s20 + $0x74] sm:$0xf] }
  0x25   : > { %827 = vmatpush.bf16.msra.mxu1 %v1561_v11  ;;  %1585 = vmatpush.bf16.msra.mxu2 %v1561_v11  ;;  %v1407_v11 = vor.u32 %v1545_v9, %v1404_v10  ;;  %v1362_v42 = vld [vmem:[%s1747_s20 + $0x80] sm:$0xf]  ;;  %v1536_v43 = vld [vmem:[%s1747_s20 + $0x84] sm:$0xf0] }
  0x26   : > { %v1363_v46 = vor.u32 %v1536_v43, %v1362_v42 }
  0x28   : > { %739 = vmatpush.bf16.msra.mxu0 %v1552_v12  ;;  %1578 = vmatpush.bf16.msra.mxu3 %v1552_v12  ;;  %v1338_v12 = vld [vmem:[%s1747_s20 + $0x50] sm:$0xf] }
  0x29   : > { %828 = vmatpush.bf16.msra.mxu1 %v1560_v13  ;;  %1586 = vmatpush.bf16.msra.mxu2 %v1560_v13  ;;  %v1530_v13 = vld [vmem:[%s1747_s20 + $0x54] sm:$0xf0] }
  0x2a   : > { %v1339_v16 = vor.u32 %v1530_v13, %v1338_v12 }
  0x2c   : > { %740 = vmatpush.bf16.msra.mxu0 %v1551_v14  ;;  %1579 = vmatpush.bf16.msra.mxu3 %v1551_v14  ;;  %v1529_v14 = vld [vmem:[%s1747_s20 + $0x54] sm:$0xf] }
  0x2d   : > { %829 = vmatpush.bf16.msra.mxu1 %v1559_v15  ;;  %1587 = vmatpush.bf16.msra.mxu2 %v1559_v15  ;;  %v1340_v15 = vld [vmem:[%s1747_s20 + $0x58] sm:$0xf0] }
  0x2e   : > { %v1343_v17 = vor.u32 %v1529_v14, %v1340_v15 }
  0x2f   : > { %741 = vmatmul.bf16.vlgmr.msra.gmra.mxu0 %v1299_v20  ;;  %786 = vmatmul.bf16.vlgmr.msra.gmra.mxu3 %v1371_v24  ;;  %v1411_v20 = vor.u32 %v1548_v19, %v1410_v18  ;;  %v1346_v24 = vld [vmem:[%s1747_s20 + $0x60] sm:$0xf] }
  0x30   : > { %830 = vmatmul.bf16.vlgmr.msra.gmra.mxu1 %v1303_v21  ;;  %875 = vmatmul.bf16.vlgmr.msra.gmra.mxu2 %v1375_v27  ;;  %v1547_v21 = vld [vmem:[%s1747_s20 + $0xe4] sm:$0xf]  ;;  %v1348_v27 = vld [vmem:[%s1747_s20 + $0x68] sm:$0xf0]  ;;  %v1347_v28 = vor.u32 %v1532_v25, %v1346_v24 }
  0x31   : > { %v1415_v23 = vor.u32 %v1547_v21, %v1412_v22  ;;  %v1351_v29 = vor.u32 %v1531_v26, %v1348_v27 }
  0x3f   : > { %746 = vmatmul.bf16.gmra.mxu0 %v1307_v32  ;;  %791 = vmatmul.bf16.gmra.mxu3 %v1379_v36  ;;  %v1419_v32 = vor.u32 %v1550_v31, %v1418_v30  ;;  %v1354_v36 = vld [vmem:[%s1747_s20 + $0x70] sm:$0xf] }
  0x40   : > { %835 = vmatmul.bf16.gmra.mxu1 %v1311_v33  ;;  %880 = vmatmul.bf16.gmra.mxu2 %v1383_v39  ;;  %v1549_v33 = vld [vmem:[%s1747_s20 + $0xf4] sm:$0xf]  ;;  %v1356_v39 = vld [vmem:[%s1747_s20 + $0x78] sm:$0xf0]  ;;  %v1355_v40 = vor.u32 %v1534_v37, %v1354_v36 }
  0x41   : > { %v1423_v35 = vor.u32 %v1549_v33, %v1420_v34  ;;  %v1359_v41 = vor.u32 %v1533_v38, %v1356_v39 }
  0x4f   : > { %751 = vmatmul.bf16.gmra.mxu0 %v1315_v44  ;;  %796 = vmatmul.bf16.gmra.mxu3 %v1387_v48  ;;  %v1535_v44 = vld [vmem:[%s1747_s20 + $0x84] sm:$0xf] }
  0x50   : > { %840 = vmatmul.bf16.gmra.mxu1 %v1319_v45  ;;  %885 = vmatmul.bf16.gmra.mxu2 %v1391_v51  ;;  %v1364_v45 = vld [vmem:[%s1747_s20 + $0x88] sm:$0xf0] }
  0x51   : > { %v1367_v47 = vor.u32 %v1535_v44, %v1364_v45 }
  0x5f   : > { %756 = vmatmul.bf16.gmra.mxu0 %v1323_v56  ;;  %801 = vmatmul.bf16.gmra.mxu3 %v1395_v60 }
  0x60   : > { %845 = vmatmul.bf16.gmra.mxu1 %v1327_v57  ;;  %890 = vmatmul.bf16.gmra.mxu2 %v1399_v63  ;;  %v1567_v57 = vld [vmem:[%s1911_s2] sm:$0xff] }
  0x61   : > { %967 = vmatpush.bf16.msrb.mxu2 %v1567_v57 }
  0x6f   : > { %761 = vmatmul.bf16.gmra.mxu0 %v1331_v4  ;;  %806 = vmatmul.bf16.gmra.mxu3 %v1403_v8 }
  0x70   : > { %850 = vmatmul.bf16.gmra.mxu1 %v1335_v5  ;;  %895 = vmatmul.bf16.gmra.mxu2 %v1407_v11 }
  0x7f   : > { %766 = vmatmul.bf16.gmra.mxu0 %v1339_v16  ;;  %811 = vmatmul.bf16.gmra.mxu3 %v1411_v20 }
  0x80   : > { %855 = vmatmul.bf16.gmra.mxu1 %v1343_v17  ;;  %900 = vmatmul.bf16.gmra.mxu2 %v1415_v23 }
  0x8f   : > { %771 = vmatmul.bf16.gmra.mxu0 %v1347_v28  ;;  %816 = vmatmul.bf16.gmra.mxu3 %v1419_v32 }
  0x90   : > { %860 = vmatmul.bf16.gmra.mxu1 %v1351_v29  ;;  %905 = vmatmul.bf16.gmra.mxu2 %v1423_v35 }
  0x9f   : > { %776 = vmatmul.bf16.gmra.mxu0 %v1355_v40 }
  0xa0   : > { %865 = vmatmul.bf16.gmra.mxu1 %v1359_v41 }
  0xac   : > { %v742_v48 = vpop.f32.mrf.mxu0 }
  0xad   : > { %v831_v49 = vpop.f32.mrf.mxu1 }
  0xae   : > { %v832_v50 = vadd.f32 %v831_v49, %v742_v48 }
  0xaf   : > { %781 = vmatmul.bf16.gmra.mxu0 %v1363_v46 }
  0xb0   : > { %870 = vmatmul.bf16.gmra.mxu1 %v1367_v47 }
  0xb2   : > { %v787_v51 = vpop.f32.mrf.mxu3 }
  0xb3   : > { %v876_v52 = vpop.f32.mrf.mxu2 }
  0xb4   : > { %v744_v53 = vpop.f32.mrf.mxu0  ;;  %v1817_v55 = vadd.f32 %v876_v52, %v787_v51 }
  0xb5   : > { %v833_v54 = vpop.f32.mrf.mxu1 }
  0xb6   : > { %v834_v56 = vadd.f32 %v833_v54, %v744_v53 }
  0xba   : > { %v789_v58 = vpop.f32.mrf.mxu3 }
  0xbb   : > { %v878_v59 = vpop.f32.mrf.mxu2 }
  0xbc   : > { %v747_v60 = vpop.f32.mrf.mxu0  ;;  %v1822_v62 = vadd.f32 %v878_v59, %v789_v58 }
  0xbd   : > { %v836_v61 = vpop.f32.mrf.mxu1 }
  0xbe   : > { %v837_v63 = vadd.f32 %v836_v61, %v747_v60 }
  0xc0   : > { %v911_v0 = vmax.f32 %v832_v50, %v837_v63 }
  0xc2   : > { %v792_v1 = vpop.f32.mrf.mxu3 }
  0xc3   : > { %v881_v2 = vpop.f32.mrf.mxu2 }
  0xc4   : > { %v749_v3 = vpop.f32.mrf.mxu0  ;;  %v1824_v5 = vadd.f32 %v881_v2, %v792_v1  ;;  %v1569_v1 = vld [vmem:[%s1913_s4 + $0x8] sm:$0xff] }
  0xc5   : > { %v838_v4 = vpop.f32.mrf.mxu1  ;;  %1007 = vmatpush.bf16.msrb.mxu3 %v1569_v1 }
  0xc6   : > { %v839_v6 = vadd.f32 %v838_v4, %v749_v3 }
  0xc8   : > { %v912_v7 = vmax.f32 %v834_v56, %v839_v6 }
  0xca   : > { %v794_v8 = vpop.f32.mrf.mxu3 }
  0xcb   : > { %v883_v9 = vpop.f32.mrf.mxu2 }
  0xcc   : > { %v752_v10 = vpop.f32.mrf.mxu0  ;;  %v1826_v12 = vadd.f32 %v883_v9, %v794_v8 }
  0xcd   : > { %v841_v11 = vpop.f32.mrf.mxu1 }
  0xce   : > { %v842_v13 = vadd.f32 %v841_v11, %v752_v10 }
  0xd0   : > { %v913_v14 = vmax.f32 %v911_v0, %v842_v13 }
  0xd2   : > { %v797_v26 = vpop.f32.mrf.mxu3 }
  0xd3   : > { %v886_v27 = vpop.f32.mrf.mxu2 }
  0xd4   : > { %v754_v15 = vpop.f32.mrf.mxu0 }
  0xd5   : > { %v843_v16 = vpop.f32.mrf.mxu1 }
  0xd6   : > { %v844_v17 = vadd.f32 %v843_v16, %v754_v15 }
  0xd8   : > { %v914_v18 = vmax.f32 %v912_v7, %v844_v17  ;;  %v1568_v7 = vld [vmem:[%s1913_s4] sm:$0xff] }
  0xd9   : > { %1008 = vmatpush.bf16.msrb.mxu3 %v1568_v7  ;;  %v1055_v7 = vlaneseq }
  0xda   : > { %v1828_v31 = vpop.f32.mrf.mxu3 }
  0xdb   : > { %v1830_v32 = vpop.f32.mrf.mxu2 }
  0xdc   : > { %v757_v19 = vpop.f32.mrf.mxu0 }
  0xdd   : > { %v846_v20 = vpop.f32.mrf.mxu1 }
  0xde   : > { %v847_v21 = vadd.f32 %v846_v20, %v757_v19  ;;  %v887_v20 = vadd.f32 %v886_v27, %v797_v26 }
  0xe0   : > { %v915_v22 = vmax.f32 %v913_v14, %v847_v21 }
  0xe2   : > { %v802_v35 = vpop.f32.mrf.mxu3 }
  0xe3   : > { %v891_v36 = vpop.f32.mrf.mxu2 }
  0xe4   : > { %v759_v23 = vpop.f32.mrf.mxu0 }
  0xe5   : > { %v848_v24 = vpop.f32.mrf.mxu1 }
  0xe6   : > { %v849_v25 = vadd.f32 %v848_v24, %v759_v23 }
  0xe8   : > { %v916_v28 = vmax.f32 %v914_v18, %v849_v25  ;;  %v892_v25 = vadd.f32 %v891_v36, %v802_v35 }
  0xea   : > { %v1832_v39 = vpop.f32.mrf.mxu3 }
  0xeb   : > { %v1834_v40 = vpop.f32.mrf.mxu2 }
  0xec   : > { %v762_v29 = vpop.f32.mrf.mxu0  ;;  %v894_v36 = vadd.f32 %v1834_v40, %v1832_v39  ;;  %v1571_v39 = vld [vmem:[%s1915_s6 + $0x8] sm:$0xff] }
  0xed   : > { %v851_v30 = vpop.f32.mrf.mxu1  ;;  %1047 = vmatpush.bf16.msra.mxu2 %v1571_v39 }
  0xee   : > { %v852_v56 = vadd.f32 %v851_v30, %v762_v29 }
  0xf0   : > { %v917_v60 = vmax.f32 %v915_v22, %v852_v56 }
  0xf2   : > { %v807_v45 = vpop.f32.mrf.mxu3 }
  0xf3   : > { %v896_v46 = vpop.f32.mrf.mxu2 }
  0xf4   : > { %v764_v33 = vpop.f32.mrf.mxu0 }
  0xf5   : > { %v853_v34 = vpop.f32.mrf.mxu1 }
  0xf6   : > { %v854_v2 = vadd.f32 %v853_v34, %v764_v33 }
  0xf8   : > { %v918_v14 = vmax.f32 %v916_v28, %v854_v2 }
  0xfa   : > { %v809_v49 = vpop.f32.mrf.mxu3 }
  0xfb   : > { %v898_v50 = vpop.f32.mrf.mxu2 }
  0xfc   : > { %v767_v37 = vpop.f32.mrf.mxu0 }
  0xfd   : > { %v856_v38 = vpop.f32.mrf.mxu1 }
  0xfe   : > { %v857_v59 = vadd.f32 %v856_v38, %v767_v37  ;;  %v897_v37 = vadd.f32 %v896_v46, %v807_v45  ;;  %v899_v46 = vadd.f32 %v898_v50, %v809_v49  ;;  %v1612_v49 = vld [vmem:[%s1912_s3] ss:$0 sm:$0xff] }
 0x100   : > { %v919_v63 = vmax.f32 %v917_v60, %v857_v59  ;;  %v1570_v60 = vld [vmem:[%s1915_s6] sm:$0xff] }
 0x101   : > { %1048 = vmatpush.bf16.msra.mxu2 %v1570_v60 }
 0x102   : > { %v812_v53 = vpop.f32.mrf.mxu3 }
 0x103   : > { %v901_v54 = vpop.f32.mrf.mxu2 }
 0x104   : > { %v769_v41 = vpop.f32.mrf.mxu0 }
 0x105   : > { %v858_v42 = vpop.f32.mrf.mxu1 }
 0x106   : > { %v859_v10 = vadd.f32 %v858_v42, %v769_v41  ;;  %v902_v42 = vadd.f32 %v901_v54, %v812_v53 }
 0x108   : > { %v920_v17 = vmax.f32 %v918_v14, %v859_v10 }
 0x10a   : > { %v814_v4 = vpop.f32.mrf.mxu3 }
 0x10b   : > { %v903_v6 = vpop.f32.mrf.mxu2 }
 0x10c   : > { %v772_v43 = vpop.f32.mrf.mxu0 }
 0x10d   : > { %v861_v44 = vpop.f32.mrf.mxu1 }
 0x10e   : > { %v862_v61 = vadd.f32 %v861_v44, %v772_v43 }
 0x110   : > { %v921_v3 = vmax.f32 %v919_v63, %v862_v61  ;;  %v1613_v63 = vld [vmem:[%s1914_s5] ss:$0 sm:$0xff] }
 0x112   : > { %v817_v28 = vpop.f32.mrf.mxu3 }
 0x113   : > { %v906_v34 = vpop.f32.mrf.mxu2 }
 0x114   : > { %v774_v47 = vpop.f32.mrf.mxu0 }
 0x115   : > { %v863_v48 = vpop.f32.mrf.mxu1 }
 0x116   : > { %v864_v15 = vadd.f32 %v863_v48, %v774_v47 }
 0x118   : > { %v922_v21 = vmax.f32 %v920_v17, %v864_v15 }
 0x11a   : > { %v819_v47 = vpop.f32.mrf.mxu3 }
 0x11c   : > { %v777_v51 = vpop.f32.mrf.mxu0 }
 0x11d   : > { %v866_v52 = vpop.f32.mrf.mxu1 }
 0x11e   : > { %v867_v0 = vadd.f32 %v866_v52, %v777_v51 }
 0x120   : > { %v923_v11 = vmax.f32 %v921_v3, %v867_v0 }
 0x124   : > { %v779_v57 = vpop.f32.mrf.mxu0 }
 0x125   : > { %v868_v58 = vpop.f32.mrf.mxu1 }
 0x126   : > { %v869_v18 = vadd.f32 %v868_v58, %v779_v57 }
 0x128   : > { %v924_v29 = vmax.f32 %v922_v21, %v869_v18 }
 0x12c   : > { %v782_v8 = vpop.f32.mrf.mxu0 }
 0x12d   : > { %v871_v9 = vpop.f32.mrf.mxu1 }
 0x12e   : > { %v872_v13 = vadd.f32 %v871_v9, %v782_v8  ;;  %v1871_v8 = vand.u32 127, %v1055_v7  ;;  %v1614_v9 = vld [vmem:[%s1916_s7] ss:$0 sm:$0xff] }
 0x130   : > { %v925_v16 = vmax.f32 %v923_v11, %v872_v13  ;;  %vm1057_vm2 = vcmp.lt.s32.totalorder %v1871_v8, 6 }
 0x132   : > { %v927_v19 = vmax.f32 %v925_v16, %v1817_v55  ;;  %v907_v55 = vadd.f32 %v906_v34, %v817_v28 }
 0x134   : > { %v929_v22 = vmax.f32 %v927_v19, %v1824_v5  ;;  %v784_v23 = vpop.f32.mrf.mxu0  ;;  %v889_v5 = vadd.f32 %v1830_v32, %v1828_v31  ;;  %v908_v31 = vpop.f32.mrf.mxu2  ;;  %v904_v32 = vadd.f32 %v903_v6, %v814_v4 }
 0x135   : > { %v873_v24 = vpop.f32.mrf.mxu1 }
 0x136   : > { %v931_v30 = vmax.f32 %v929_v22, %v887_v20  ;;  %v874_v33 = vadd.f32 %v873_v24, %v784_v23 }
 0x138   : > { %v933_v38 = vmax.f32 %v931_v30, %v892_v25  ;;  %v926_v41 = vmax.f32 %v924_v29, %v874_v33 }
 0x13a   : > { %v935_v43 = vmax.f32 %v933_v38, %v897_v37  ;;  %v928_v26 = vmax.f32 %v926_v41, %v1822_v62 }
 0x13c   : > { %v937_v27 = vmax.f32 %v935_v43, %v902_v42  ;;  %v930_v35 = vmax.f32 %v928_v26, %v1826_v12  ;;  %v909_v12 = vadd.f32 %v908_v31, %v819_v47 }
 0x13e   : > { %v939_v44 = vmax.f32 %v937_v27, %v907_v55  ;;  %v932_v45 = vmax.f32 %v930_v35, %v889_v5 }
 0x140   : > { %942 = vst.msk [vmem:[%s402_s13] sm:$0xff] %vm941_vm0, %v939_v44  ;;  %v934_v62 = vmax.f32 %v932_v45, %v894_v36 }
 0x142   : > { %v936_v48 = vmax.f32 %v934_v62, %v899_v46 }
 0x144   : > { %v938_v51 = vmax.f32 %v936_v48, %v904_v32 }
 0x146   : > { %v940_v52 = vmax.f32 %v938_v51, %v909_v12 }
 0x148   : > { %943 = vst.msk [vmem:[%s402_s13 + $0x8] sm:$0xff] %vm941_vm0, %v940_v52  ;;  %v944_v53 = vpack.c.bf16 %v940_v52, %v939_v44 }
 0x14a   : > { %1492 = vmatmul.msk.bf16.vlgmr.msrb.gmra.mxu2 %vm941_vm0, %v944_v53 }
 0x1cd   : > { %v969_v40 = vpop.f32.mrf.mxu2 }
 0x1ce   : > { %v970_v50 = vadd.f32 %v1612_v49, %v969_v40 }
 0x1d0   : > { %v974_v57 = vmax.f32 %v970_v50, 0.0 }
 0x1d5   : > { %v971_v54 = vpop.f32.mrf.mxu2 }
 0x1d6   : > { %v972_v56 = vadd.f32 %v1612_v49, %v971_v54 }
 0x1d8   : > { %v975_v58 = vmax.f32 %v972_v56, 0.0 }
 0x1da   : > { %v976_v59 = vpack.c.bf16 %v975_v58, %v974_v57 }
 0x1dc   : > { %1501 = vmatmul.msk.bf16.vlgmr.msrb.gmra.mxu3 %vm997_vm1, %v976_v59 }
 0x25f   : > { %v1010_v61 = vpop.f32.mrf.mxu3 }
 0x260   : > { %v1011_v0 = vadd.f32 %v1613_v63, %v1010_v61 }
 0x262   : > { %v1015_v3 = vmax.f32 %v1011_v0, 0.0 }
 0x267   : > { %v1012_v1 = vpop.f32.mrf.mxu3 }
 0x268   : > { %v1013_v2 = vadd.f32 %v1613_v63, %v1012_v1 }
 0x26a   : > { %v1016_v4 = vmax.f32 %v1013_v2, 0.0 }
 0x26c   : > { %v1017_v6 = vpack.c.bf16 %v1016_v4, %v1015_v3 }
 0x26e   : > { %1510 = vmatmul.msk.bf16.vlgmr.msra.gmra.mxu2 %vm997_vm1, %v1017_v6 }
 0x2f1   : > { %v1050_v10 = vpop.f32.mrf.mxu2 }
 0x2f2   : > { %v1051_v11 = vadd.f32 %v1614_v9, %v1050_v10 }
 0x2f4   : > { %v1058_v13 = vsel %vm1057_vm2, %v1051_v11, -3.4028235e+38  ;;  %v1511_v37 = vmul.f32 -1.442695, %v1051_v11 }
 0x2f5   : > { %v1060_v14 = vsel %vm941_vm0, %v1058_v13, -inf }
 0x2f6   : > { %1061 = vmax.xlane.f32.xlu0 %v1060_v14 }
 0x2f9   : > { %v1052_v15 = vpop.f32.mrf.mxu2 }
 0x2fa   : > { %v1053_v16 = vadd.f32 %v1614_v9, %v1052_v15 }
 0x2fc   : > { %v1059_v17 = vsel %vm1057_vm2, %v1053_v16, -3.4028235e+38  ;;  %v1512_v38 = vmul.f32 -1.442695, %v1053_v16 }
 0x2fd   : > { %v1063_v18 = vsel %vm941_vm0, %v1059_v17, -inf }
 0x2fe   : > { %1064 = vmax.xlane.f32.xlu0 %v1063_v18 }
 0x369   : > { %v1062_v19 = vpop.xlane.xlu0 %1061 }
 0x36a   : > { %v1066_v20 = vsub.f32 %v1051_v11, %v1062_v19 }
 0x36c   : > { %v1068_v21 = vmul.f32 1.442695, %v1066_v20 }
 0x36e   : > { %1615 = vpow2.f32 %v1068_v21 }
 0x371   : > { %v1065_v22 = vpop.xlane.xlu0 %1064 }
 0x372   : > { %v1067_v23 = vsub.f32 %v1053_v16, %v1065_v22 }
 0x374   : > { %v1616_v24 = vpop.eup %1615  ;;  %v1070_v25 = vmul.f32 1.442695, %v1067_v23 }
 0x375   : > { %v1072_v29 = vsel %vm1057_vm2, %v1616_v24, 0.0 }
 0x376   : > { %1617 = vpow2.f32 %v1070_v25  ;;  %v1074_v30 = vsel %vm941_vm0, %v1072_v29, 0.0 }
 0x377   : > { %1075 = vadd.xlane.f32.xlu1 %v1074_v30  ;;  %1619 = vpow2.f32 %v1511_v37 }
 0x378   : > { %1621 = vpow2.f32 %v1512_v38 }
 0x37c   : > { %v1618_v33 = vpop.eup %1617 }
 0x37d   : > { %v1073_v28 = vsel %vm1057_vm2, %v1618_v33, 0.0  ;;  %v1620_v41 = vpop.eup %1619 }
 0x37e   : > { %v1077_v34 = vsel %vm941_vm0, %v1073_v28, 0.0  ;;  %v1090_v42 = vadd.f32 1.0, %v1620_v41  ;;  %v1622_v55 = vpop.eup %1621 }
 0x37f   : > { %1078 = vadd.xlane.f32.xlu1 %v1077_v34  ;;  %v1091_v43 = vadd.f32 1.0, %v1622_v55 }
 0x380   : > { %1623 = vrcp.f32 %v1090_v42  ;;  %v1103_v47 = vand.u32 2147483648, %v1090_v42  ;;  %vm1097_vm4 = vweird.f32 %v1090_v42  ;;  %v1101_v31 = vand.u32 2147483647, %v1090_v42 }
 0x381   : > { %1625 = vrcp.f32 %v1091_v43  ;;  %v1118_v50 = vand.u32 2147483648, %v1091_v43  ;;  %vm1112_vm8 = vweird.f32 %v1091_v43  ;;  %v1116_v54 = vand.u32 2147483647, %v1091_v43 }
 0x382   : > { %v1104_v51 = vor.u32 1.1754944e-38, %v1103_v47  ;;  %vm1102_vm6 = vcmp.eq.f32.partialorder %v1101_v31, 8.507059e+37 }
 0x383   : > { %v1119_v58 = vor.u32 1.1754944e-38, %v1118_v50  ;;  %vm1117_vm10 = vcmp.eq.f32.partialorder %v1116_v54, 8.507059e+37 }
 0x386   : > { %v1624_v26 = vpop.eup %1623 }
 0x387   : > { %v1093_v5 = vmul.f32 %v1624_v26, %v1090_v42  ;;  %v1626_v35 = vpop.eup %1625  ;;  %vm1098_vm3 = vweird.f32 %v1624_v26 }
 0x388   : > { %v1108_v44 = vmul.f32 %v1626_v35, %v1091_v43  ;;  %vm1099_vm5 = vmor %vm1097_vm4, %vm1098_vm3  ;;  %vm1113_vm7 = vweird.f32 %v1626_v35 }
 0x389   : > { %v1094_v27 = vsub.f32 1.0, %v1093_v5  ;;  %vm1114_vm9 = vmor %vm1112_vm8, %vm1113_vm7 }
 0x38a   : > { %v1109_v46 = vsub.f32 1.0, %v1108_v44 }
 0x38b   : > { %v1095_v36 = vmul.f32 %v1624_v26, %v1094_v27 }
 0x38c   : > { %v1110_v48 = vmul.f32 %v1626_v35, %v1109_v46 }
 0x38d   : > { %v1096_v62 = vadd.f32 %v1624_v26, %v1095_v36 }
 0x38e   : > { %v1111_v49 = vadd.f32 %v1626_v35, %v1110_v48 }
 0x38f   : > { %v1100_v32 = vsel %vm1099_vm5, %v1624_v26, %v1096_v62 }
 0x390   : > { %v1105_v39 = vsel %vm1102_vm6, %v1104_v51, %v1100_v32  ;;  %v1115_v56 = vsel %vm1114_vm9, %v1626_v35, %v1111_v49 }
 0x391   : > { %v1120_v60 = vsel %vm1117_vm10, %v1119_v58, %v1115_v56 }
 0x3ea   : > { %v1076_v45 = vpop.xlane.xlu1 %1075 }
 0x3eb   : > { %1627 = vrcp.f32 %v1076_v45 }
 0x3f1   : > { %v1628_v12 = vpop.eup %1627 }
 0x3f2   : > { %v1082_v52 = vmul.f32 %v1628_v12, %v1072_v29  ;;  %v1079_v53 = vpop.xlane.xlu1 %1078 }
 0x3f3   : > { %1629 = vrcp.f32 %v1079_v53 }
 0x3f4   : > { %v1122_v40 = vsel %vm1057_vm2, %v1082_v52, %v1105_v39 }
 0x3f5   : > { %1124 = vst.msk [vmem:[%s411_s26] sm:$0xff] %vm941_vm0, %v1122_v40 }
 0x3f9   : > { %v1630_v57 = vpop.eup %1629 }
 0x3fa   : > { %v1083_v59 = vmul.f32 %v1630_v57, %v1073_v28 }
 0x3fc   : > { %v1123_v61 = vsel %vm1057_vm2, %v1083_v59, %v1120_v60 }
 0x3fd   : > { %1125 = vst.msk [vmem:[%s411_s26 + $0x8] sm:$0xff] %vm941_vm0, %v1123_v61 }
 0x3fe PF: > { %s20_s11 = sadd.s32 1, %s1653_s11   ;;  %s1919_s30 = smov %s1649_s10 }
 0x3ff   : > { %p17_p5 = scmp.ge.s32.totalorder %s20_s11, 4   ;;  %s1920_s10 = smov %s1922_s12 }
 0x401   :  { %19 = sbr.rel (!%p17_p5) target bundleno = 2 (0x2), region = 97 }

</bundles_post_ra>
